<compile_context>
chip_gen: v6e
topology: v6e:2x2x1
jax: 0.10.0
libtpu: 0.0.40
codegen_flags: <defaults>
</compile_context>

<pallas_src>
import functools

import jax
import jax.numpy as jnp
from jax.experimental import pallas as pl
from jax.experimental.pallas import tpu as pltpu

KERNELS = (2, 3, 4)


def _charcnn_kernel(x_ref, w_ref, o_ref, *, L, Hp, kernels):
    # x_ref : [TB, Lp, H]   batch tile, channels-last, Lp % 8 == 0 (padded time)
    # w_ref : [H, S*Hp]     S = sum(kernels); tap blocks of Hp lanes each
    # o_ref : [TB, Hp]
    TB, Lp, H = x_ref.shape
    M = TB * Lp

    x_flat = x_ref[...].reshape(M, H)                 # layout no-op (Lp % 8 == 0)
    # One fused, lane-dense MXU matmul for all branches/taps; f32 accumulation.
    y = jnp.dot(x_flat, w_ref[...], preferred_element_type=jnp.float32)  # [M, S*Hp]

    neg_inf = jnp.float32(-jnp.inf)
    # Time index within each batch row (static), for masking wrapped/padded steps.
    t_ids = jax.lax.broadcasted_iota(jnp.int32, (Lp, Hp), 0)             # [Lp, Hp]

    out = None
    tap = 0
    for k in kernels:
        T = L - k + 1                                  # valid conv outputs (static)
        acc = y[:, tap * Hp:(tap + 1) * Hp]            # tap 0 (lane-aligned slice)
        for j in range(1, k):
            tj = y[:, (tap + j) * Hp:(tap + j + 1) * Hp]
            # Align tap j with tap 0 in time.  Rows that wrap across batch rows land
            # at t >= Lp - j >= T and are masked below.  XLU sublane rotate.
            acc = acc + pltpu.roll(tj, shift=M - j, axis=0)
        acc3 = acc.reshape(TB, Lp, Hp)                 # layout no-op
        acc3 = jnp.where((t_ids < T)[None, :, :], acc3, neg_inf)
        pooled = jnp.max(acc3, axis=1)                 # AdaptiveMaxPool1d(1) -> [TB, Hp]
        out = pooled if out is None else jnp.maximum(out, pooled)
        tap += k

    o_ref[...] = out.astype(o_ref.dtype)


def char_cnn_forward(x, weights, *, tb=None, compute_dtype=jnp.bfloat16):
    """x: [B, L, H]; weights: dict k -> [H_out, H_in, k] (torch Conv1d layout, bias=False).

    compute_dtype=jnp.bfloat16 (default) feeds the bf16-native MXU; accumulation is f32.
    Use compute_dtype=jnp.float32 for bit-accurate parity with the PyTorch module.
    """
    B, L, H = x.shape
    assert L >= max(KERNELS), "sequence too short for the largest conv kernel"

    S = sum(KERNELS)                                   # total taps (= 9)
    Hp = -(-H // 128) * 128                            # lane-dense padded out-channels
    Lp = -(-L // 8) * 8                                # sublane-aligned padded time
    cbytes = jnp.dtype(compute_dtype).itemsize

    def est_vmem(tb_):
        x_buf = 2 * tb_ * Lp * H * cbytes              # double-buffered activation tile
        w_buf = H * S * Hp * cbytes                    # resident weights (single-buffered)
        o_buf = 2 * tb_ * Hp * 4
        inter = tb_ * Lp * S * Hp * 4                  # fused matmul output (f32)
        inter += 3 * tb_ * Lp * Hp * 4                 # acc / rolled tap / mask slack
        return x_buf + w_buf + o_buf + inter

    budget = 24 * 2**20                                # conservative: fits v7x 64 MiB VMEM
    if tb is None:
        tb = -(-512 // Lp)                             # target ~512 effective matmul rows
        tb = -(-tb // 8) * 8
        half_b = -(-(-(-B // 2)) // 8) * 8             # ceil(B/2) rounded up to 8
        tb = min(tb, max(8, half_b))                   # keep >=2 grid steps (v7x megacore)
        while tb > 8 and est_vmem(tb) > budget:
            tb -= 8
    tb = max(8, -(-tb // 8) * 8)
    tb = min(tb, -(-B // 8) * 8)                       # don't tile beyond padded batch
    Bp = -(-B // tb) * tb

    xp = x.astype(compute_dtype)
    if Bp != B or Lp != L:
        xp = jnp.pad(xp, ((0, Bp - B), (0, Lp - L), (0, 0)))

    # Pack all Conv1d weights (torch [out, in, k]) into one [H, S*Hp] matrix:
    # branch-major, one Hp-wide lane block per tap, out-channels zero-padded to Hp.
    blocks = []
    for k in KERNELS:
        w = jnp.asarray(weights[k], jnp.float32)               # [Hout, Hin, k]
        w = jnp.transpose(w, (2, 1, 0))                        # [k, Hin, Hout]
        w = jnp.pad(w, ((0, 0), (0, 0), (0, Hp - H)))          # [k, Hin, Hp]
        blocks.append(jnp.transpose(w, (1, 0, 2)).reshape(H, k * Hp))
    w_packed = jnp.concatenate(blocks, axis=1).astype(compute_dtype)   # [H, S*Hp]

    kernel = functools.partial(_charcnn_kernel, L=L, Hp=Hp, kernels=KERNELS)

    cost = pl.CostEstimate(
        flops=2 * Bp * Lp * H * S * Hp,
        transcendentals=0,
        bytes_accessed=int(xp.size * cbytes + w_packed.size * cbytes + Bp * Hp * 4),
    )
    vmem_limit = int(min(56 * 2**20, max(32 * 2**20, 2 * est_vmem(tb))))

    def build(single_buffer_weights):
        w_kwargs = {}
        if single_buffer_weights:
            # Constant block index across the grid -> single buffer is enough.
            w_kwargs["pipeline_mode"] = pl.Buffered(1)
        in_specs = [
            pl.BlockSpec((tb, Lp, H), lambda b: (b, 0, 0)),
            pl.BlockSpec((H, S * Hp), lambda b: (0, 0), **w_kwargs),
        ]
        return pl.pallas_call(
            kernel,
            out_shape=jax.ShapeDtypeStruct((Bp, Hp), jnp.float32),
            grid_spec=pltpu.PrefetchScalarGridSpec(
                num_scalar_prefetch=0,
                grid=(Bp // tb,),
                in_specs=in_specs,
                out_specs=pl.BlockSpec((tb, Hp), lambda b: (b, 0)),
            ),
            compiler_params=pltpu.CompilerParams(
                dimension_semantics=("parallel",),
                vmem_limit_bytes=vmem_limit,
            ),
            cost_estimate=cost,
        )

    try:
        out = build(single_buffer_weights=True)(xp, w_packed)
    except Exception:
        # Fallback if this JAX build rejects buffer_count=1 for pallas_call specs.
        out = build(single_buffer_weights=False)(xp, w_packed)

    return out[:B, :H]


def char_cnn_reference(x, weights):
    """Pure-JAX reference replicating the PyTorch forward exactly."""
    B, L, H = x.shape
    branch_outs = []
    for k in KERNELS:
        w = weights[k]                                 # [Hout, Hin, k]
        T = L - k + 1
        conv = jnp.zeros((B, T, H), jnp.float32)
        for j in range(k):
            conv = conv + jnp.einsum('blc,oc->blo', x[:, j:j + T, :], w[:, :, j])
        branch_outs.append(jnp.max(conv, axis=1))      # adaptive max pool -> [B, H]
    return jnp.max(jnp.stack(branch_outs, axis=0), axis=0)


if __name__ == "__main__":
    B, L, H = 2, 16, 32
    key = jax.random.PRNGKey(0)
    kx, k2, k3, k4 = jax.random.split(key, 4)

    x = jax.random.normal(kx, (B, L, H), dtype=jnp.float32)
    # Deterministic synthetic Conv1d weights, torch layout [out, in, k], bias=False.
    weights = {
        2: jax.random.normal(k2, (H, H, 2), dtype=jnp.float32) * 0.1,
        3: jax.random.normal(k3, (H, H, 3), dtype=jnp.float32) * 0.1,
        4: jax.random.normal(k4, (H, H, 4), dtype=jnp.float32) * 0.1,
    }

    ref = char_cnn_reference(x, weights)

    # f32 path: parity with the PyTorch f32 module.
    out_f32 = char_cnn_forward(x, weights, compute_dtype=jnp.float32)
    jax.block_until_ready(out_f32)
    assert out_f32.shape == (B, H)
    assert jnp.allclose(out_f32, ref, atol=1e-4, rtol=1e-4), \
        f"f32 max abs err {jnp.max(jnp.abs(out_f32 - ref))}"

    # Default bf16 fast path (MXU-native inputs, f32 accumulation).
    out_bf16 = char_cnn_forward(x, weights)
    jax.block_until_ready(out_bf16)
    assert out_bf16.shape == (B, H)
    assert jnp.allclose(out_bf16, ref, atol=5e-2, rtol=5e-2), \
        f"bf16 max abs err {jnp.max(jnp.abs(out_bf16 - ref))}"

    print("KERNEL_OK")
</pallas_src>

<mosaic_0001>
module attributes {stable_mosaic.version = 11 : i64} {
  func.func @_charcnn_kernel(%arg0: i32, %arg1: memref<8x16x32xf32, #tpu.memory_space<vmem>>, %arg2: memref<32x1152xf32, #tpu.memory_space<vmem>>, %arg3: memref<8x128xf32, #tpu.memory_space<vmem>>) attributes {dimension_semantics = [#tpu.dimension_semantics<parallel>], iteration_bounds = array<i64: 1>, scalar_prefetch = 0 : i64, scratch_operands = 0 : i64, tpu.core_type = #tpu.core_type<tc>, window_params = [{transform_indices = @transform_0, window_bounds = array<i64: 8, 16, 32>}, {pipeline_mode = #tpu.pipeline_mode<synchronous>, transform_indices = @transform_1, window_bounds = array<i64: 32, 1152>}, {transform_indices = @transform_2, window_bounds = array<i64: 8, 128>}]} {
    %c0 = arith.constant 0 : index
    %c0_0 = arith.constant 0 : index
    %c0_1 = arith.constant 0 : index
    %0 = vector.load %arg1[%c0, %c0_0, %c0_1] : memref<8x16x32xf32, #tpu.memory_space<vmem>>, vector<8x16x32xf32>
    %1 = vector.shape_cast %0 : vector<8x16x32xf32> to vector<128x32xf32>
    %c0_2 = arith.constant 0 : index
    %c0_3 = arith.constant 0 : index
    %2 = vector.load %arg2[%c0_2, %c0_3] : memref<32x1152xf32, #tpu.memory_space<vmem>>, vector<32x1152xf32>
    %cst = arith.constant dense<0.000000e+00> : vector<128x1152xf32>
    %3 = tpu.matmul %1, %2, %cst {dimension_numbers = #tpu.dot_dimension_numbers<[1], [0], [0], [1], [0, 0, 1, 1], [], []>} : vector<128x32xf32>, vector<32x1152xf32>, vector<128x1152xf32> -> vector<128x1152xf32>
    %4 = tpu.iota {dimensions = array<i32: 0>} : vector<16x128xi32>
    %5 = vector.extract_strided_slice %3 {offsets = [0, 0], sizes = [128, 128], strides = [1, 1]} : vector<128x1152xf32> to vector<128x128xf32>
    %6 = vector.extract_strided_slice %3 {offsets = [0, 128], sizes = [128, 128], strides = [1, 1]} : vector<128x1152xf32> to vector<128x128xf32>
    %c127_i32 = arith.constant 127 : i32
    %7 = tpu.dynamic_rotate %6 by %c127_i32 dim 0 : vector<128x128xf32>, i32 -> vector<128x128xf32>
    %8 = arith.addf %5, %7 : vector<128x128xf32>
    %9 = vector.shape_cast %8 : vector<128x128xf32> to vector<8x16x128xf32>
    %c15_i32 = arith.constant 15 : i32
    %10 = vector.broadcast %c15_i32 : i32 to vector<16x128xi32>
    %11 = arith.cmpi slt, %4, %10 : vector<16x128xi32>
    %12 = vector.shape_cast %11 : vector<16x128xi1> to vector<1x16x128xi1>
    %cst_4 = arith.constant 0xFF800000 : f32
    %13 = vector.shape_cast %12 : vector<1x16x128xi1> to vector<1x16x128xi1>
    %14 = vector.broadcast %13 : vector<1x16x128xi1> to vector<8x16x128xi1>
    %15 = vector.broadcast %cst_4 : f32 to vector<8x16x128xf32>
    %16 = arith.select %14, %9, %15 : vector<8x16x128xi1>, vector<8x16x128xf32>
    %cst_5 = arith.constant dense<0xFF800000> : vector<8x128xf32>
    %17 = vector.multi_reduction <maximumf>, %16, %cst_5 [1] : vector<8x16x128xf32> to vector<8x128xf32>
    %18 = vector.extract_strided_slice %3 {offsets = [0, 256], sizes = [128, 128], strides = [1, 1]} : vector<128x1152xf32> to vector<128x128xf32>
    %19 = vector.extract_strided_slice %3 {offsets = [0, 384], sizes = [128, 128], strides = [1, 1]} : vector<128x1152xf32> to vector<128x128xf32>
    %c127_i32_6 = arith.constant 127 : i32
    %20 = tpu.dynamic_rotate %19 by %c127_i32_6 dim 0 : vector<128x128xf32>, i32 -> vector<128x128xf32>
    %21 = arith.addf %18, %20 : vector<128x128xf32>
    %22 = vector.extract_strided_slice %3 {offsets = [0, 512], sizes = [128, 128], strides = [1, 1]} : vector<128x1152xf32> to vector<128x128xf32>
    %c126_i32 = arith.constant 126 : i32
    %23 = tpu.dynamic_rotate %22 by %c126_i32 dim 0 : vector<128x128xf32>, i32 -> vector<128x128xf32>
    %24 = arith.addf %21, %23 : vector<128x128xf32>
    %25 = vector.shape_cast %24 : vector<128x128xf32> to vector<8x16x128xf32>
    %c14_i32 = arith.constant 14 : i32
    %26 = vector.broadcast %c14_i32 : i32 to vector<16x128xi32>
    %27 = arith.cmpi slt, %4, %26 : vector<16x128xi32>
    %28 = vector.shape_cast %27 : vector<16x128xi1> to vector<1x16x128xi1>
    %cst_7 = arith.constant 0xFF800000 : f32
    %29 = vector.shape_cast %28 : vector<1x16x128xi1> to vector<1x16x128xi1>
    %30 = vector.broadcast %29 : vector<1x16x128xi1> to vector<8x16x128xi1>
    %31 = vector.broadcast %cst_7 : f32 to vector<8x16x128xf32>
    %32 = arith.select %30, %25, %31 : vector<8x16x128xi1>, vector<8x16x128xf32>
    %cst_8 = arith.constant dense<0xFF800000> : vector<8x128xf32>
    %33 = vector.multi_reduction <maximumf>, %32, %cst_8 [1] : vector<8x16x128xf32> to vector<8x128xf32>
    %34 = arith.maximumf %17, %33 : vector<8x128xf32>
    %35 = vector.extract_strided_slice %3 {offsets = [0, 640], sizes = [128, 128], strides = [1, 1]} : vector<128x1152xf32> to vector<128x128xf32>
    %36 = vector.extract_strided_slice %3 {offsets = [0, 768], sizes = [128, 128], strides = [1, 1]} : vector<128x1152xf32> to vector<128x128xf32>
    %c127_i32_9 = arith.constant 127 : i32
    %37 = tpu.dynamic_rotate %36 by %c127_i32_9 dim 0 : vector<128x128xf32>, i32 -> vector<128x128xf32>
    %38 = arith.addf %35, %37 : vector<128x128xf32>
    %39 = vector.extract_strided_slice %3 {offsets = [0, 896], sizes = [128, 128], strides = [1, 1]} : vector<128x1152xf32> to vector<128x128xf32>
    %c126_i32_10 = arith.constant 126 : i32
    %40 = tpu.dynamic_rotate %39 by %c126_i32_10 dim 0 : vector<128x128xf32>, i32 -> vector<128x128xf32>
    %41 = arith.addf %38, %40 : vector<128x128xf32>
    %42 = vector.extract_strided_slice %3 {offsets = [0, 1024], sizes = [128, 128], strides = [1, 1]} : vector<128x1152xf32> to vector<128x128xf32>
    %c125_i32 = arith.constant 125 : i32
    %43 = tpu.dynamic_rotate %42 by %c125_i32 dim 0 : vector<128x128xf32>, i32 -> vector<128x128xf32>
    %44 = arith.addf %41, %43 : vector<128x128xf32>
    %45 = vector.shape_cast %44 : vector<128x128xf32> to vector<8x16x128xf32>
    %c13_i32 = arith.constant 13 : i32
    %46 = vector.broadcast %c13_i32 : i32 to vector<16x128xi32>
    %47 = arith.cmpi slt, %4, %46 : vector<16x128xi32>
    %48 = vector.shape_cast %47 : vector<16x128xi1> to vector<1x16x128xi1>
    %cst_11 = arith.constant 0xFF800000 : f32
    %49 = vector.shape_cast %48 : vector<1x16x128xi1> to vector<1x16x128xi1>
    %50 = vector.broadcast %49 : vector<1x16x128xi1> to vector<8x16x128xi1>
    %51 = vector.broadcast %cst_11 : f32 to vector<8x16x128xf32>
    %52 = arith.select %50, %45, %51 : vector<8x16x128xi1>, vector<8x16x128xf32>
    %cst_12 = arith.constant dense<0xFF800000> : vector<8x128xf32>
    %53 = vector.multi_reduction <maximumf>, %52, %cst_12 [1] : vector<8x16x128xf32> to vector<8x128xf32>
    %54 = arith.maximumf %34, %53 : vector<8x128xf32>
    %c0_13 = arith.constant 0 : index
    %c0_14 = arith.constant 0 : index
    %55 = vector.load %arg3[%c0_13, %c0_14] : memref<8x128xf32, #tpu.memory_space<vmem>>, vector<8x128xf32>
    tpu.vector_store %arg3[%c0_13, %c0_14], %54 {strides = array<i32>} : memref<8x128xf32, #tpu.memory_space<vmem>>, vector<8x128xf32>,
    return
  }
  func.func @transform_0(%arg0: i32) -> (i32, i32, i32) {
    %c0_i32 = arith.constant 0 : i32
    %c0_i32_0 = arith.constant 0 : i32
    %c0_i32_1 = arith.constant 0 : i32
    return %arg0, %c0_i32, %c0_i32_0 : i32, i32, i32
  }
  func.func @transform_1(%arg0: i32) -> (i32, i32) {
    %c0_i32 = arith.constant 0 : i32
    %c0_i32_0 = arith.constant 0 : i32
    %c0_i32_1 = arith.constant 0 : i32
    return %c0_i32, %c0_i32_0 : i32, i32
  }
  func.func @transform_2(%arg0: i32) -> (i32, i32) {
    %c0_i32 = arith.constant 0 : i32
    %c0_i32_0 = arith.constant 0 : i32
    return %arg0, %c0_i32 : i32, i32
  }
}

module attributes {stable_mosaic.version = 11 : i64} {
  func.func @_charcnn_kernel(%arg0: i32, %arg1: memref<8x16x32xf32, #tpu.memory_space<vmem>>, %arg2: memref<32x1152xf32, #tpu.memory_space<vmem>>, %arg3: memref<8x128xf32, #tpu.memory_space<vmem>>) attributes {dimension_semantics = [#tpu.dimension_semantics<parallel>], iteration_bounds = array<i64: 1>, scalar_prefetch = 0 : i64, scratch_operands = 0 : i64, tpu.core_type = #tpu.core_type<tc>, window_params = [{transform_indices = @transform_0, window_bounds = array<i64: 8, 16, 32>}, {pipeline_mode = #tpu.pipeline_mode<synchronous>, transform_indices = @transform_1, window_bounds = array<i64: 32, 1152>}, {transform_indices = @transform_2, window_bounds = array<i64: 8, 128>}]} {
    %c0 = arith.constant 0 : index
    %c0_0 = arith.constant 0 : index
    %c0_1 = arith.constant 0 : index
    %0 = vector.load %arg1[%c0, %c0_0, %c0_1] : memref<8x16x32xf32, #tpu.memory_space<vmem>>, vector<8x16x32xf32>
    %1 = vector.shape_cast %0 : vector<8x16x32xf32> to vector<128x32xf32>
    %c0_2 = arith.constant 0 : index
    %c0_3 = arith.constant 0 : index
    %2 = vector.load %arg2[%c0_2, %c0_3] : memref<32x1152xf32, #tpu.memory_space<vmem>>, vector<32x1152xf32>
    %cst = arith.constant dense<0.000000e+00> : vector<128x1152xf32>
    %3 = tpu.matmul %1, %2, %cst {dimension_numbers = #tpu.dot_dimension_numbers<[1], [0], [0], [1], [0, 0, 1, 1], [], []>} : vector<128x32xf32>, vector<32x1152xf32>, vector<128x1152xf32> -> vector<128x1152xf32>
    %4 = tpu.iota {dimensions = array<i32: 0>} : vector<16x128xi32>
    %5 = vector.extract_strided_slice %3 {offsets = [0, 0], sizes = [128, 128], strides = [1, 1]} : vector<128x1152xf32> to vector<128x128xf32>
    %6 = vector.extract_strided_slice %3 {offsets = [0, 128], sizes = [128, 128], strides = [1, 1]} : vector<128x1152xf32> to vector<128x128xf32>
    %c127_i32 = arith.constant 127 : i32
    %7 = tpu.dynamic_rotate %6 by %c127_i32 dim 0 : vector<128x128xf32>, i32 -> vector<128x128xf32>
    %8 = arith.addf %5, %7 : vector<128x128xf32>
    %9 = vector.shape_cast %8 : vector<128x128xf32> to vector<8x16x128xf32>
    %c15_i32 = arith.constant 15 : i32
    %10 = vector.broadcast %c15_i32 : i32 to vector<16x128xi32>
    %11 = arith.cmpi slt, %4, %10 : vector<16x128xi32>
    %12 = vector.shape_cast %11 : vector<16x128xi1> to vector<1x16x128xi1>
    %cst_4 = arith.constant 0xFF800000 : f32
    %13 = vector.shape_cast %12 : vector<1x16x128xi1> to vector<1x16x128xi1>
    %14 = vector.broadcast %13 : vector<1x16x128xi1> to vector<8x16x128xi1>
    %15 = vector.broadcast %cst_4 : f32 to vector<8x16x128xf32>
    %16 = arith.select %14, %9, %15 : vector<8x16x128xi1>, vector<8x16x128xf32>
    %cst_5 = arith.constant dense<0xFF800000> : vector<8x128xf32>
    %17 = vector.multi_reduction <maximumf>, %16, %cst_5 [1] : vector<8x16x128xf32> to vector<8x128xf32>
    %18 = vector.extract_strided_slice %3 {offsets = [0, 256], sizes = [128, 128], strides = [1, 1]} : vector<128x1152xf32> to vector<128x128xf32>
    %19 = vector.extract_strided_slice %3 {offsets = [0, 384], sizes = [128, 128], strides = [1, 1]} : vector<128x1152xf32> to vector<128x128xf32>
    %c127_i32_6 = arith.constant 127 : i32
    %20 = tpu.dynamic_rotate %19 by %c127_i32_6 dim 0 : vector<128x128xf32>, i32 -> vector<128x128xf32>
    %21 = arith.addf %18, %20 : vector<128x128xf32>
    %22 = vector.extract_strided_slice %3 {offsets = [0, 512], sizes = [128, 128], strides = [1, 1]} : vector<128x1152xf32> to vector<128x128xf32>
    %c126_i32 = arith.constant 126 : i32
    %23 = tpu.dynamic_rotate %22 by %c126_i32 dim 0 : vector<128x128xf32>, i32 -> vector<128x128xf32>
    %24 = arith.addf %21, %23 : vector<128x128xf32>
    %25 = vector.shape_cast %24 : vector<128x128xf32> to vector<8x16x128xf32>
    %c14_i32 = arith.constant 14 : i32
    %26 = vector.broadcast %c14_i32 : i32 to vector<16x128xi32>
    %27 = arith.cmpi slt, %4, %26 : vector<16x128xi32>
    %28 = vector.shape_cast %27 : vector<16x128xi1> to vector<1x16x128xi1>
    %cst_7 = arith.constant 0xFF800000 : f32
    %29 = vector.shape_cast %28 : vector<1x16x128xi1> to vector<1x16x128xi1>
    %30 = vector.broadcast %29 : vector<1x16x128xi1> to vector<8x16x128xi1>
    %31 = vector.broadcast %cst_7 : f32 to vector<8x16x128xf32>
    %32 = arith.select %30, %25, %31 : vector<8x16x128xi1>, vector<8x16x128xf32>
    %cst_8 = arith.constant dense<0xFF800000> : vector<8x128xf32>
    %33 = vector.multi_reduction <maximumf>, %32, %cst_8 [1] : vector<8x16x128xf32> to vector<8x128xf32>
    %34 = arith.maximumf %17, %33 : vector<8x128xf32>
    %35 = vector.extract_strided_slice %3 {offsets = [0, 640], sizes = [128, 128], strides = [1, 1]} : vector<128x1152xf32> to vector<128x128xf32>
    %36 = vector.extract_strided_slice %3 {offsets = [0, 768], sizes = [128, 128], strides = [1, 1]} : vector<128x1152xf32> to vector<128x128xf32>
    %c127_i32_9 = arith.constant 127 : i32
    %37 = tpu.dynamic_rotate %36 by %c127_i32_9 dim 0 : vector<128x128xf32>, i32 -> vector<128x128xf32>
    %38 = arith.addf %35, %37 : vector<128x128xf32>
    %39 = vector.extract_strided_slice %3 {offsets = [0, 896], sizes = [128, 128], strides = [1, 1]} : vector<128x1152xf32> to vector<128x128xf32>
    %c126_i32_10 = arith.constant 126 : i32
    %40 = tpu.dynamic_rotate %39 by %c126_i32_10 dim 0 : vector<128x128xf32>, i32 -> vector<128x128xf32>
    %41 = arith.addf %38, %40 : vector<128x128xf32>
    %42 = vector.extract_strided_slice %3 {offsets = [0, 1024], sizes = [128, 128], strides = [1, 1]} : vector<128x1152xf32> to vector<128x128xf32>
    %c125_i32 = arith.constant 125 : i32
    %43 = tpu.dynamic_rotate %42 by %c125_i32 dim 0 : vector<128x128xf32>, i32 -> vector<128x128xf32>
    %44 = arith.addf %41, %43 : vector<128x128xf32>
    %45 = vector.shape_cast %44 : vector<128x128xf32> to vector<8x16x128xf32>
    %c13_i32 = arith.constant 13 : i32
    %46 = vector.broadcast %c13_i32 : i32 to vector<16x128xi32>
    %47 = arith.cmpi slt, %4, %46 : vector<16x128xi32>
    %48 = vector.shape_cast %47 : vector<16x128xi1> to vector<1x16x128xi1>
    %cst_11 = arith.constant 0xFF800000 : f32
    %49 = vector.shape_cast %48 : vector<1x16x128xi1> to vector<1x16x128xi1>
    %50 = vector.broadcast %49 : vector<1x16x128xi1> to vector<8x16x128xi1>
    %51 = vector.broadcast %cst_11 : f32 to vector<8x16x128xf32>
    %52 = arith.select %50, %45, %51 : vector<8x16x128xi1>, vector<8x16x128xf32>
    %cst_12 = arith.constant dense<0xFF800000> : vector<8x128xf32>
    %53 = vector.multi_reduction <maximumf>, %52, %cst_12 [1] : vector<8x16x128xf32> to vector<8x128xf32>
    %54 = arith.maximumf %34, %53 : vector<8x128xf32>
    %c0_13 = arith.constant 0 : index
    %c0_14 = arith.constant 0 : index
    %55 = vector.load %arg3[%c0_13, %c0_14] : memref<8x128xf32, #tpu.memory_space<vmem>>, vector<8x128xf32>
    tpu.vector_store %arg3[%c0_13, %c0_14], %54 {strides = array<i32>} : memref<8x128xf32, #tpu.memory_space<vmem>>, vector<8x128xf32>,
    return
  }
  func.func @transform_0(%arg0: i32) -> (i32, i32, i32) {
    %c0_i32 = arith.constant 0 : i32
    %c0_i32_0 = arith.constant 0 : i32
    %c0_i32_1 = arith.constant 0 : i32
    return %arg0, %c0_i32, %c0_i32_0 : i32, i32, i32
  }
  func.func @transform_1(%arg0: i32) -> (i32, i32) {
    %c0_i32 = arith.constant 0 : i32
    %c0_i32_0 = arith.constant 0 : i32
    %c0_i32_1 = arith.constant 0 : i32
    return %c0_i32, %c0_i32_0 : i32, i32
  }
  func.func @transform_2(%arg0: i32) -> (i32, i32) {
    %c0_i32 = arith.constant 0 : i32
    %c0_i32_0 = arith.constant 0 : i32
    return %arg0, %c0_i32 : i32, i32
  }
}

</mosaic_0001>

<bundles_post_ra>
// kernel: tpu_custom_call.1
= control target key start
LH: loop header
LB: loop body
LE: loop exit
PB: predicated region body
PF: predicated region fallthrough
CT: control target
= control target key end

     0   :  { %7 = vsyncpa [#allocation3], 0  ;;  %s2567_s0 = inlined_call_operand.hbm [shape: f32[8,16,32], index: 0, kind: input, shape index: {}]   ;;  %s2568_s1 = inlined_call_operand.hbm [shape: f32[32,1152], index: 1, kind: input, shape index: {}]   ;;  %s2569_s2 = inlined_call_operand.hbm [shape: f32[8,128], index: 2, kind: output, shape index: {}]  }
   0x1   :  { %8 = vsyncpa [#allocation6], 0 }
   0x2   :  { %9 = vsyncpa [#allocation4], 0  ;;  %s1728_s9 = smov [#allocation2]  }
   0x3   :  { %s15_s10 = sshll.u32 %s1728_s9, 4  ;;  %s16_s10 = int_to_ptr.vmem [resolvable:$true] %s15_s10 }
   0x4   :  { %s1670_s11 = scalar_lea.vmem %s16_s10, 2048  ;;  %p1675_p1 = scmp.lt.s32.totalorder %s16_s10, %s16_s10 }
   0x5   :  { %p1671_p0 = scmp.ne.s32.totalorder %s16_s10, %s1670_s11  ;;  %p1676_p2 = scmp.lt.s32.totalorder %s1670_s11, %s1670_s11 }
   0x7   :  { %p1677_p3 = por %p1676_p2, %p1675_p1 }
   0x9   :  { %p1678_p4 = pnand %p1677_p3, %p1671_p0 }
   0xb   :  { %1681 = shalt.err (!%p1678_p4)
}
   0xc   :  { %s1729_s12 = smov 128   ;;  %s1730_s13 = smov 8  }
   0xd   :  { %21 = dma.hbm_to_vmem [thread:$0]  %s2567_s0, 2048, %s16_s10, [#allocation3], %s1729_s12, %s1729_s12, %s1730_s13  }
   0xe   :  { %s1731_s16 = smov [#allocation5]  }
   0xf   :  { %s27_s17 = sshll.u32 %s1731_s16, 4  ;;  %s28_s17 = int_to_ptr.vmem [resolvable:$true] %s27_s17 }
  0x10   :  { %s1690_s18 = scalar_lea.vmem %s28_s17, 4608  ;;  %p1695_p6 = scmp.lt.s32.totalorder %s28_s17, %s28_s17 }
  0x11   :  { %p1691_p5 = scmp.ne.s32.totalorder %s28_s17, %s1690_s18  ;;  %p1696_p7 = scmp.lt.s32.totalorder %s1690_s18, %s1690_s18 }
  0x13   :  { %p1697_p8 = por %p1696_p7, %p1695_p6 }
  0x15   :  { %p1698_p9 = pnand %p1697_p8, %p1691_p5 }
  0x17   :  { %1701 = shalt.err (!%p1698_p9)
}
  0x18   :  { %s1732_s19 = smov 1152   ;;  %s1733_s20 = smov 72  }
  0x19   :  { %33 = dma.hbm_to_vmem [thread:$0]  %s2568_s1, 4608, %s28_s17, [#allocation6], %s1732_s19, %s1732_s19, %s1733_s20  }
  0x1a   :  { %1722 = dma.done.wait [#allocation3], 2048  }
  0x1b   :  { %1723 = vsyncadd [#allocation3], 4294965248 }
  0x1c   :  { %1724 = dma.done.wait [#allocation6], 4608  }
  0x1d   :  { %1725 = vsyncadd [#allocation6], 4294962688  ;;  %v1734_v0 = vmov 0.0   ;;  %v84_v1 = vld [vmem:[#allocation5 + $0xe0] sm:$0xff]  ;;  %v83_v2 = vld [vmem:[#allocation5 + $0xd8] sm:$0xff]  ;;  %vm92_vm0 = vcmask 261120   ;;  %v930_v53 = vlaneseq }
  0x1e   :  { %205 = vmatprep.mubr.f32.mxu0 %v1734_v0  ;;  %277 = vmatprep.mubr.f32.mxu1 %v1734_v0  ;;  %v75_v3 = vld [vmem:[#allocation5 + $0x98] sm:$0xff]  ;;  %v74_v4 = vld [vmem:[#allocation5 + $0x90] sm:$0xff]  ;;  %v65_v6 = vld [vmem:[#allocation5 + $0x48] sm:$0xff]  ;;  %vm1482_vm7 = vcmask 1041409   ;;  %vm1484_vm8 = vcmask 1042434   ;;  %vm1486_vm9 = vcmask 1043459  }
  0x1f   :  { %165 = vmatprep.subr.mxu0 %v84_v1  ;;  %1646 = vmatprep.subr.mxu1 %v84_v1  ;;  %v66_v5 = vld [vmem:[#allocation5 + $0x50] sm:$0xff]  ;;  %v57_v7 = vld [vmem:[#allocation5 + $0x8] sm:$0xff]  ;;  %v56_v8 = vld [vmem:[#allocation5] sm:$0xff]  ;;  %v2015_v58 = vshrl.u32 %v930_v53, 7  ;;  %vm1488_vm10 = vcmask 1044484   ;;  %vm1490_vm11 = vcmask 1045509  }
  0x20   :  { %166 = vmatpush1.msra.mxu0 %v83_v2  ;;  %1650 = vmatpush1.msra.mxu1 %v83_v2  ;;  %v1759_v9 = vld [vmem:[#allocation2] sm:$0xff]  ;;  %v86_v11 = vld [vmem:[#allocation5 + $0xf0] sm:$0xff]  ;;  %v85_v13 = vld [vmem:[#allocation5 + $0xe8] sm:$0xff]  ;;  %vm1492_vm12 = vcmask 1046534   ;;  %s1735_s0 = smov [#allocation7]   ;;  %vm1494_vm13 = vcmask 1047559  }
  0x21   :  { %167 = vmatprep.subr.mxu0 %v75_v3  ;;  %1647 = vmatprep.subr.mxu1 %v75_v3  ;;  %v1761_v10 = vld [vmem:[#allocation2 + $0x60] sm:$0xff]  ;;  %v87_v14 = vld [vmem:[#allocation5 + $0xf8] sm:$0xff]  ;;  %v1767_v15 = vld [vmem:[#allocation2 + $0x8] sm:$0xff]  ;;  %vm949_vm1 = vcmp.lt.s32.totalorder %v2015_v58, 7  ;;  %vm1124_vm3 = vcmp.lt.s32.totalorder %v2015_v58, 6  ;;  %vm1355_vm5 = vcmp.lt.s32.totalorder %v2015_v58, 5 }
  0x22   :  { %168 = vmatpush1.msra.mxu0 %v74_v4  ;;  %1651 = vmatpush1.msra.mxu1 %v74_v4  ;;  %v88_v12 = vld [vmem:[#allocation5 + $0x100] sm:$0xff]  ;;  %v1769_v16 = vld [vmem:[#allocation2 + $0x68] sm:$0xff]  ;;  %v79_v20 = vld [vmem:[#allocation5 + $0xb8] sm:$0xff]  ;;  %s1504_s1 = sshll.u32 %s1735_s0, 4  ;;  %s1505_s1 = int_to_ptr.vmem [resolvable:$true] %s1504_s1 }
  0x23   :  { %169 = vmatprep.subr.mxu0 %v66_v5  ;;  %1648 = vmatprep.subr.mxu1 %v66_v5  ;;  %v77_v17 = vld [vmem:[#allocation5 + $0xa8] sm:$0xff]  ;;  %v76_v18 = vld [vmem:[#allocation5 + $0xa0] sm:$0xff]  ;;  %v1778_v21 = vld [vmem:[#allocation2 + $0x10] sm:$0xff]  ;;  %s1702_s23 = scalar_lea.vmem %s1505_s1, 128  ;;  %p1707_p11 = scmp.lt.s32.totalorder %s1505_s1, %s1505_s1 }
  0x24   :  { %170 = vmatpush1.msra.mxu0 %v65_v6  ;;  %1652 = vmatpush1.msra.mxu1 %v65_v6  ;;  %v68_v19 = vld [vmem:[#allocation5 + $0x60] sm:$0xff]  ;;  %v1780_v22 = vld [vmem:[#allocation2 + $0x70] sm:$0xff]  ;;  %v67_v23 = vld [vmem:[#allocation5 + $0x58] sm:$0xff]  ;;  %p1703_p10 = scmp.ne.s32.totalorder %s1505_s1, %s1702_s23  ;;  %p1708_p12 = scmp.lt.s32.totalorder %s1702_s23, %s1702_s23 }
  0x25   :  { %171 = vmatprep.subr.mxu0 %v57_v7  ;;  %1649 = vmatprep.subr.mxu1 %v57_v7  ;;  %v59_v24 = vld [vmem:[#allocation5 + $0x18] sm:$0xff]  ;;  %v58_v25 = vld [vmem:[#allocation5 + $0x10] sm:$0xff]  ;;  %v69_v31 = vld [vmem:[#allocation5 + $0x68] sm:$0xff]  ;;  %v2026_v7 = vadd.s32 8, %v2015_v58 }
  0x26   :  { %172 = vmatpush1.msra.mxu0 %v56_v8  ;;  %1653 = vmatpush1.msra.mxu1 %v56_v8  ;;  %v78_v26 = vld [vmem:[#allocation5 + $0xb0] sm:$0xff]  ;;  %v1788_v27 = vld [vmem:[#allocation2 + $0x18] sm:$0xff]  ;;  %v1799_v32 = vld [vmem:[#allocation2 + $0x20] sm:$0xff]  ;;  %p1709_p13 = por %p1708_p12, %p1707_p11 }
  0x27   :  { %1514 = vmatmul.mubr.msk.f32.vlgmr.msra.gmra.mxu0 %vm92_vm0, %v1759_v9  ;;  %1526 = vmatmul.mubr.msk.f32.vlgmr.msra.gmra.mxu1 %vm92_vm0, %v1761_v10  ;;  %v1790_v28 = vld [vmem:[#allocation2 + $0x78] sm:$0xff]  ;;  %v90_v29 = vld [vmem:[#allocation5 + $0x110] sm:$0xff]  ;;  %v89_v33 = vld [vmem:[#allocation5 + $0x108] sm:$0xff]  ;;  %vm983_vm2 = vcmp.lt.s32.totalorder %v2026_v7, 15  ;;  %vm1158_vm4 = vcmp.lt.s32.totalorder %v2026_v7, 14  ;;  %vm1389_vm6 = vcmp.lt.s32.totalorder %v2026_v7, 13 }
  0x28   :  { %326 = vmatprep.subr.mxu1 %v86_v11  ;;  %487 = vmatprep.subr.mxu0 %v88_v12  ;;  %v70_v30 = vld [vmem:[#allocation5 + $0x70] sm:$0xff]  ;;  %v81_v34 = vld [vmem:[#allocation5 + $0xc8] sm:$0xff]  ;;  %v80_v35 = vld [vmem:[#allocation5 + $0xc0] sm:$0xff]  ;;  %p1710_p0 = pnand %p1709_p13, %p1703_p10 }
  0x29   :  { %327 = vmatpush1.msra.mxu1 %v85_v13  ;;  %488 = vmatpush1.msra.mxu0 %v87_v14  ;;  %v61_v36 = vld [vmem:[#allocation5 + $0x28] sm:$0xff]  ;;  %v60_v38 = vld [vmem:[#allocation5 + $0x20] sm:$0xff]  ;;  %v71_v40 = vld [vmem:[#allocation5 + $0x78] sm:$0xff] }
  0x2a   :  { %211 = vmatprep.mubr.f32.mxu0 %v1734_v0  ;;  %283 = vmatprep.mubr.f32.mxu1 %v1734_v0  ;;  %v1806_v37 = vld [vmem:[#allocation2 + $0x28] sm:$0xff]  ;;  %v72_v39 = vld [vmem:[#allocation5 + $0x80] sm:$0xff]  ;;  %v91_v41 = vld [vmem:[#allocation5 + $0x118] sm:$0xff] }
  0x2b   :  { %1515 = vmatmul.mubr.msk.f32.gmra.mxu0 %vm92_vm0, %v1767_v15  ;;  %1527 = vmatmul.mubr.msk.f32.gmra.mxu1 %vm92_vm0, %v1769_v16  ;;  %v1815_v42 = vld [vmem:[#allocation2 + $0x30] sm:$0xff]  ;;  %v63_v43 = vld [vmem:[#allocation5 + $0x38] sm:$0xff]  ;;  %v1831_v46 = vld [vmem:[#allocation2 + $0x40] sm:$0xff] }
  0x2c   :  { %328 = vmatprep.subr.mxu1 %v77_v17  ;;  %217 = vmatprep.mubr.f32.mxu0 %v1734_v0  ;;  %v62_v44 = vld [vmem:[#allocation5 + $0x30] sm:$0xff]  ;;  %v1823_v45 = vld [vmem:[#allocation2 + $0x38] sm:$0xff]  ;;  %v1839_v47 = vld [vmem:[#allocation2 + $0x48] sm:$0xff] }
  0x2d   :  { %329 = vmatpush1.msra.mxu1 %v76_v18  ;;  %289 = vmatprep.mubr.f32.mxu1 %v1734_v0  ;;  %v1847_v48 = vld [vmem:[#allocation2 + $0x50] sm:$0xff]  ;;  %v1855_v49 = vld [vmem:[#allocation2 + $0x58] sm:$0xff]  ;;  %v73_v51 = vld [vmem:[#allocation5 + $0x88] sm:$0xff] }
  0x2e   :  { %330 = vmatprep.subr.mxu1 %v68_v19  ;;  %489 = vmatprep.subr.mxu0 %v79_v20  ;;  %v82_v50 = vld [vmem:[#allocation5 + $0xd0] sm:$0xff]  ;;  %v64_v52 = vld [vmem:[#allocation5 + $0x40] sm:$0xff] }
  0x2f   :  { %1516 = vmatmul.mubr.msk.f32.gmra.mxu0 %vm92_vm0, %v1778_v21  ;;  %1528 = vmatmul.mubr.msk.f32.gmra.mxu1 %vm92_vm0, %v1780_v22 }
  0x30   :  { %331 = vmatpush1.msra.mxu1 %v67_v23  ;;  %223 = vmatprep.mubr.f32.mxu0 %v1734_v0 }
  0x31   :  { %295 = vmatprep.mubr.f32.mxu1 %v1734_v0  ;;  %332 = vmatprep.subr.mxu1 %v59_v24 }
  0x32   :  { %333 = vmatpush1.msra.mxu1 %v58_v25  ;;  %490 = vmatpush1.msra.mxu0 %v78_v26 }
  0x33   :  { %1517 = vmatmul.mubr.msk.f32.gmra.mxu0 %vm92_vm0, %v1788_v27  ;;  %1529 = vmatmul.mubr.msk.f32.gmra.mxu1 %vm92_vm0, %v1790_v28 }
  0x34   :  { %229 = vmatprep.mubr.f32.mxu0 %v1734_v0  ;;  %366 = vmatprep.mubr.f32.mxu1 %v1734_v0 }
  0x35   :  { %648 = vmatprep.subr.mxu1 %v90_v29  ;;  %491 = vmatprep.subr.mxu0 %v70_v30 }
  0x36   :  { %492 = vmatpush1.msra.mxu0 %v69_v31 }
  0x37   :  { %1518 = vmatmul.mubr.msk.f32.gmra.mxu0 %vm92_vm0, %v1799_v32  ;;  %1530 = vmatmul.mubr.msk.f32.vlgmr.msra.gmra.mxu1 %vm92_vm0, %v1759_v9 }
  0x38   :  { %649 = vmatpush1.msra.mxu1 %v89_v33  ;;  %235 = vmatprep.mubr.f32.mxu0 %v1734_v0 }
  0x39   :  { %372 = vmatprep.mubr.f32.mxu1 %v1734_v0  ;;  %650 = vmatprep.subr.mxu1 %v81_v34 }
  0x3a   :  { %651 = vmatpush1.msra.mxu1 %v80_v35  ;;  %493 = vmatprep.subr.mxu0 %v61_v36 }
  0x3b   :  { %1519 = vmatmul.mubr.msk.f32.gmra.mxu0 %vm92_vm0, %v1806_v37  ;;  %1531 = vmatmul.mubr.msk.f32.gmra.mxu1 %vm92_vm0, %v1767_v15 }
  0x3c   :  { %241 = vmatprep.mubr.f32.mxu0 %v1734_v0  ;;  %378 = vmatprep.mubr.f32.mxu1 %v1734_v0 }
  0x3d   :  { %494 = vmatpush1.msra.mxu0 %v60_v38  ;;  %652 = vmatprep.subr.mxu1 %v72_v39 }
  0x3e   :  { %653 = vmatpush1.msra.mxu1 %v71_v40  ;;  %1614 = vmatprep.subr.mxu0 %v91_v41 }
  0x3f   :  { %1520 = vmatmul.mubr.msk.f32.gmra.mxu0 %vm92_vm0, %v1815_v42  ;;  %1532 = vmatmul.mubr.msk.f32.gmra.mxu1 %vm92_vm0, %v1778_v21 }
  0x40   :  { %247 = vmatprep.mubr.f32.mxu0 %v1734_v0  ;;  %384 = vmatprep.mubr.f32.mxu1 %v1734_v0 }
  0x41   :  { %654 = vmatprep.subr.mxu1 %v63_v43 }
  0x42   :  { %655 = vmatpush1.msra.mxu1 %v62_v44 }
  0x43   :  { %1521 = vmatmul.mubr.msk.f32.gmra.mxu0 %vm92_vm0, %v1823_v45  ;;  %1533 = vmatmul.mubr.msk.f32.gmra.mxu1 %vm92_vm0, %v1788_v27 }
  0x44   :  { %253 = vmatprep.mubr.f32.mxu0 %v1734_v0  ;;  %390 = vmatprep.mubr.f32.mxu1 %v1734_v0 }
  0x47   :  { %1522 = vmatmul.mubr.msk.f32.gmra.mxu0 %vm92_vm0, %v1831_v46  ;;  %1534 = vmatmul.mubr.msk.f32.gmra.mxu1 %vm92_vm0, %v1799_v32 }
  0x48   :  { %259 = vmatprep.mubr.f32.mxu0 %v1734_v0  ;;  %396 = vmatprep.mubr.f32.mxu1 %v1734_v0 }
  0x4b   :  { %1523 = vmatmul.mubr.msk.f32.gmra.mxu0 %vm92_vm0, %v1839_v47  ;;  %1535 = vmatmul.mubr.msk.f32.gmra.mxu1 %vm92_vm0, %v1806_v37 }
  0x4c   :  { %265 = vmatprep.mubr.f32.mxu0 %v1734_v0  ;;  %402 = vmatprep.mubr.f32.mxu1 %v1734_v0 }
  0x4f   :  { %1524 = vmatmul.mubr.msk.f32.gmra.mxu0 %vm92_vm0, %v1847_v48  ;;  %1536 = vmatmul.mubr.msk.f32.gmra.mxu1 %vm92_vm0, %v1815_v42 }
  0x50   :  { %271 = vmatprep.mubr.f32.mxu0 %v1734_v0  ;;  %408 = vmatprep.mubr.f32.mxu1 %v1734_v0 }
  0x53   :  { %1525 = vmatmul.mubr.msk.f32.gmra.mxu0 %vm92_vm0, %v1855_v49  ;;  %1537 = vmatmul.mubr.msk.f32.gmra.mxu1 %vm92_vm0, %v1823_v45 }
  0x54   :  { %414 = vmatprep.mubr.f32.mxu1 %v1734_v0  ;;  %527 = vmatprep.mubr.f32.mxu0 %v1734_v0 }
  0x57   :  { %1538 = vmatmul.mubr.msk.f32.gmra.mxu1 %vm92_vm0, %v1831_v46  ;;  %1546 = vmatmul.mubr.msk.f32.vlgmr.msra.gmra.mxu0 %vm92_vm0, %v1759_v9 }
  0x58   :  { %1615 = vmatpush3.msra.mxu0 %v91_v41  ;;  %420 = vmatprep.mubr.f32.mxu1 %v1734_v0 }
  0x59   :  { %533 = vmatprep.mubr.f32.mxu0 %v1734_v0  ;;  %1616 = vmatprep.subr.mxu0 %v82_v50 }
  0x5a   :  { %1617 = vmatpush3.msra.mxu0 %v82_v50 }
  0x5b   :  { %1539 = vmatmul.mubr.msk.f32.gmra.mxu1 %vm92_vm0, %v1839_v47  ;;  %1547 = vmatmul.mubr.msk.f32.gmra.mxu0 %vm92_vm0, %v1767_v15 }
  0x5c   :  { %426 = vmatprep.mubr.f32.mxu1 %v1734_v0  ;;  %539 = vmatprep.mubr.f32.mxu0 %v1734_v0 }
  0x5d   :  { %1618 = vmatprep.subr.mxu0 %v73_v51 }
  0x5e   :  { %1619 = vmatpush3.msra.mxu0 %v73_v51 }
  0x5f   :  { %1540 = vmatmul.mubr.msk.f32.gmra.mxu1 %vm92_vm0, %v1847_v48  ;;  %1548 = vmatmul.mubr.msk.f32.gmra.mxu0 %vm92_vm0, %v1778_v21 }
  0x60   :  { %432 = vmatprep.mubr.f32.mxu1 %v1734_v0  ;;  %545 = vmatprep.mubr.f32.mxu0 %v1734_v0 }
  0x61   :  { %1620 = vmatprep.subr.mxu0 %v64_v52 }
  0x62   :  { %1621 = vmatpush3.msra.mxu0 %v64_v52 }
  0x63   :  { %1541 = vmatmul.mubr.msk.f32.gmra.mxu1 %vm92_vm0, %v1855_v49  ;;  %1549 = vmatmul.mubr.msk.f32.gmra.mxu0 %vm92_vm0, %v1788_v27 }
  0x64   :  { %438 = vmatprep.mubr.f32.mxu1 %v1734_v0  ;;  %551 = vmatprep.mubr.f32.mxu0 %v1734_v0 }
  0x67   :  { %1542 = vmatmul.mubr.msk.f32.gmra.mxu1 %vm92_vm0, %v1761_v10  ;;  %1550 = vmatmul.mubr.msk.f32.gmra.mxu0 %vm92_vm0, %v1799_v32 }
  0x68   :  { %444 = vmatprep.mubr.f32.mxu1 %v1734_v0  ;;  %557 = vmatprep.mubr.f32.mxu0 %v1734_v0 }
  0x6b   :  { %1543 = vmatmul.mubr.msk.f32.gmra.mxu1 %vm92_vm0, %v1769_v16  ;;  %1551 = vmatmul.mubr.msk.f32.gmra.mxu0 %vm92_vm0, %v1806_v37 }
  0x6c   :  { %450 = vmatprep.mubr.f32.mxu1 %v1734_v0  ;;  %563 = vmatprep.mubr.f32.mxu0 %v1734_v0 }
  0x6f   :  { %1544 = vmatmul.mubr.msk.f32.gmra.mxu1 %vm92_vm0, %v1780_v22  ;;  %1552 = vmatmul.mubr.msk.f32.gmra.mxu0 %vm92_vm0, %v1815_v42 }
  0x70   :  { %456 = vmatprep.mubr.f32.mxu1 %v1734_v0  ;;  %569 = vmatprep.mubr.f32.mxu0 %v1734_v0 }
  0x73   :  { %1545 = vmatmul.mubr.msk.f32.gmra.mxu1 %vm92_vm0, %v1790_v28  ;;  %1553 = vmatmul.mubr.msk.f32.gmra.mxu0 %vm92_vm0, %v1823_v45 }
  0x74   :  { %575 = vmatprep.mubr.f32.mxu0 %v1734_v0  ;;  %688 = vmatprep.mubr.f32.mxu1 %v1734_v0 }
  0x77   :  { %1554 = vmatmul.mubr.msk.f32.gmra.mxu0 %vm92_vm0, %v1831_v46  ;;  %1562 = vmatmul.mubr.msk.f32.vlgmr.msra.gmra.mxu1 %vm92_vm0, %v1759_v9 }
  0x78   :  { %581 = vmatprep.mubr.f32.mxu0 %v1734_v0  ;;  %694 = vmatprep.mubr.f32.mxu1 %v1734_v0 }
  0x7b   :  { %1555 = vmatmul.mubr.msk.f32.gmra.mxu0 %vm92_vm0, %v1839_v47  ;;  %1563 = vmatmul.mubr.msk.f32.gmra.mxu1 %vm92_vm0, %v1767_v15 }
  0x7c   :  { %587 = vmatprep.mubr.f32.mxu0 %v1734_v0  ;;  %700 = vmatprep.mubr.f32.mxu1 %v1734_v0 }
  0x7f   :  { %1556 = vmatmul.mubr.msk.f32.gmra.mxu0 %vm92_vm0, %v1847_v48  ;;  %1564 = vmatmul.mubr.msk.f32.gmra.mxu1 %vm92_vm0, %v1778_v21 }
  0x80   :  { %593 = vmatprep.mubr.f32.mxu0 %v1734_v0  ;;  %706 = vmatprep.mubr.f32.mxu1 %v1734_v0 }
  0x83   :  { %1557 = vmatmul.mubr.msk.f32.gmra.mxu0 %vm92_vm0, %v1855_v49  ;;  %1565 = vmatmul.mubr.msk.f32.gmra.mxu1 %vm92_vm0, %v1788_v27 }
  0x84   :  { %599 = vmatprep.mubr.f32.mxu0 %v1734_v0  ;;  %712 = vmatprep.mubr.f32.mxu1 %v1734_v0 }
  0x87   :  { %1558 = vmatmul.mubr.msk.f32.gmra.mxu0 %vm92_vm0, %v1761_v10  ;;  %1566 = vmatmul.mubr.msk.f32.gmra.mxu1 %vm92_vm0, %v1799_v32 }
  0x88   :  { %605 = vmatprep.mubr.f32.mxu0 %v1734_v0  ;;  %718 = vmatprep.mubr.f32.mxu1 %v1734_v0 }
  0x8b   :  { %1559 = vmatmul.mubr.msk.f32.gmra.mxu0 %vm92_vm0, %v1769_v16  ;;  %1567 = vmatmul.mubr.msk.f32.gmra.mxu1 %vm92_vm0, %v1806_v37 }
  0x8c   :  { %611 = vmatprep.mubr.f32.mxu0 %v1734_v0  ;;  %724 = vmatprep.mubr.f32.mxu1 %v1734_v0 }
  0x8f   :  { %1560 = vmatmul.mubr.msk.f32.gmra.mxu0 %vm92_vm0, %v1780_v22  ;;  %1568 = vmatmul.mubr.msk.f32.gmra.mxu1 %vm92_vm0, %v1815_v42 }
  0x90   :  { %617 = vmatprep.mubr.f32.mxu0 %v1734_v0  ;;  %730 = vmatprep.mubr.f32.mxu1 %v1734_v0 }
  0x93   :  { %1561 = vmatmul.mubr.msk.f32.gmra.mxu0 %vm92_vm0, %v1790_v28  ;;  %1569 = vmatmul.mubr.msk.f32.gmra.mxu1 %vm92_vm0, %v1823_v45 }
  0x94   :  { %736 = vmatprep.mubr.f32.mxu1 %v1734_v0  ;;  %1622 = vmatprep.mubr.msk.f32.mxu0 %vm92_vm0, %v1759_v9 }
  0x97   :  { %1570 = vmatmul.mubr.msk.f32.gmra.mxu1 %vm92_vm0, %v1831_v46  ;;  %1623 = vmatmul.mubr.msk.f32.vlgmr.msra.gmra.mxu0 %vm92_vm0, %v1767_v15 }
  0x98   :  { %742 = vmatprep.mubr.f32.mxu1 %v1734_v0  ;;  %1625 = vmatprep.mubr.msk.f32.mxu0 %vm92_vm0, %v1778_v21 }
  0x9b   :  { %1571 = vmatmul.mubr.msk.f32.gmra.mxu1 %vm92_vm0, %v1839_v47  ;;  %1626 = vmatmul.mubr.msk.f32.gmra.mxu0 %vm92_vm0, %v1788_v27 }
  0x9c   :  { %748 = vmatprep.mubr.f32.mxu1 %v1734_v0  ;;  %1628 = vmatprep.mubr.msk.f32.mxu0 %vm92_vm0, %v1799_v32 }
  0x9f   :  { %1572 = vmatmul.mubr.msk.f32.gmra.mxu1 %vm92_vm0, %v1847_v48  ;;  %1629 = vmatmul.mubr.msk.f32.gmra.mxu0 %vm92_vm0, %v1806_v37 }
  0xa0   :  { %754 = vmatprep.mubr.f32.mxu1 %v1734_v0  ;;  %1631 = vmatprep.mubr.msk.f32.mxu0 %vm92_vm0, %v1815_v42 }
  0xa3   :  { %1573 = vmatmul.mubr.msk.f32.gmra.mxu1 %vm92_vm0, %v1855_v49  ;;  %1632 = vmatmul.mubr.msk.f32.gmra.mxu0 %vm92_vm0, %v1823_v45 }
  0xa4   :  { %760 = vmatprep.mubr.f32.mxu1 %v1734_v0  ;;  %1634 = vmatprep.mubr.msk.f32.mxu0 %vm92_vm0, %v1831_v46 }
  0xa7   :  { %1574 = vmatmul.mubr.msk.f32.gmra.mxu1 %vm92_vm0, %v1761_v10  ;;  %1635 = vmatmul.mubr.msk.f32.gmra.mxu0 %vm92_vm0, %v1839_v47 }
  0xa8   :  { %766 = vmatprep.mubr.f32.mxu1 %v1734_v0  ;;  %1637 = vmatprep.mubr.msk.f32.mxu0 %vm92_vm0, %v1847_v48 }
  0xab   :  { %1575 = vmatmul.mubr.msk.f32.gmra.mxu1 %vm92_vm0, %v1769_v16  ;;  %1638 = vmatmul.mubr.msk.f32.gmra.mxu0 %vm92_vm0, %v1855_v49 }
  0xac   :  { %772 = vmatprep.mubr.f32.mxu1 %v1734_v0  ;;  %1640 = vmatprep.mubr.msk.f32.mxu0 %vm92_vm0, %v1761_v10 }
  0xaf   :  { %1576 = vmatmul.mubr.msk.f32.gmra.mxu1 %vm92_vm0, %v1780_v22  ;;  %1641 = vmatmul.mubr.msk.f32.gmra.mxu0 %vm92_vm0, %v1769_v16 }
  0xb0   :  { %778 = vmatprep.mubr.f32.mxu1 %v1734_v0  ;;  %1643 = vmatprep.mubr.msk.f32.mxu0 %vm92_vm0, %v1780_v22 }
  0xb3   :  { %1577 = vmatmul.mubr.msk.f32.gmra.mxu1 %vm92_vm0, %v1790_v28  ;;  %1644 = vmatmul.mubr.msk.f32.gmra.mxu0 %vm92_vm0, %v1790_v28 }
  0xe7   :  { %v207_v54 = vpop.f32.mrf.mxu0  ;;  %v279_v55 = vpop.f32.mrf.mxu1 }
  0xe9   :  { %v209_v56 = vpop.f32.mrf.mxu0  ;;  %v2013_v57 = vpop.f32.mrf.mxu1 }
  0xea   :  { %v933_v63 = vrot.slane %v209_v56, 1  ;;  %v945_v0 = vrot.slane %v2013_v57, 1 }
  0xeb   :  { %v213_v59 = vpop.f32.mrf.mxu0  ;;  %v285_v60 = vpop.f32.mrf.mxu1 }
  0xed   :  { %v215_v61 = vpop.f32.mrf.mxu0  ;;  %v287_v62 = vpop.f32.mrf.mxu1 }
  0xee   :  { %v934_v1 = vrot.slane %v215_v61, 1  ;;  %v946_v2 = vrot.slane %v287_v62, 1 }
  0xef   :  { %v219_v3 = vpop.f32.mrf.mxu0  ;;  %v291_v4 = vpop.f32.mrf.mxu1 }
  0xf0   :  { %v964_v5 = vsel %vm949_vm1, %v933_v63, %v934_v1  ;;  %v952_v6 = vsel %vm949_vm1, %v945_v0, %v946_v2 }
  0xf1   :  { %v966_v8 = vadd.f32 %v964_v5, %v207_v54  ;;  %v978_v9 = vadd.f32 %v952_v6, %v279_v55  ;;  %v221_v10 = vpop.f32.mrf.mxu0  ;;  %v293_v11 = vpop.f32.mrf.mxu1 }
  0xf2   :  { %v935_v12 = vrot.slane %v221_v10, 1  ;;  %v947_v13 = vrot.slane %v293_v11, 1 }
  0xf3   :  { %v225_v14 = vpop.f32.mrf.mxu0  ;;  %v297_v15 = vpop.f32.mrf.mxu1 }
  0xf4   :  { %v963_v16 = vsel %vm949_vm1, %v934_v1, %v935_v12  ;;  %v951_v17 = vsel %vm949_vm1, %v946_v2, %v947_v13 }
  0xf5   :  { %v967_v18 = vadd.f32 %v963_v16, %v213_v59  ;;  %v979_v19 = vadd.f32 %v951_v17, %v285_v60  ;;  %v227_v20 = vpop.f32.mrf.mxu0  ;;  %v299_v21 = vpop.f32.mrf.mxu1 }
  0xf6   :  { %v936_v22 = vrot.slane %v227_v20, 1  ;;  %v948_v23 = vrot.slane %v299_v21, 1 }
  0xf7   :  { %v989_v24 = vsel %vm983_vm2, %v967_v18, -inf  ;;  %v1001_v25 = vsel %vm983_vm2, %v979_v19, -inf  ;;  %v231_v26 = vpop.f32.mrf.mxu0  ;;  %v368_v27 = vpop.f32.mrf.mxu1 }
  0xf8   :  { %v2037_v28 = vmax.f32 %v966_v8, %v989_v24  ;;  %v2039_v29 = vmax.f32 %v978_v9, %v1001_v25  ;;  %v962_v30 = vsel %vm949_vm1, %v935_v12, %v936_v22  ;;  %v950_v31 = vsel %vm949_vm1, %v947_v13, %v948_v23 }
  0xf9   :  { %v968_v32 = vadd.f32 %v962_v30, %v219_v3  ;;  %v965_v33 = vsel %vm949_vm1, %v948_v23, %v933_v63  ;;  %v980_v34 = vadd.f32 %v950_v31, %v291_v4  ;;  %v233_v35 = vpop.f32.mrf.mxu0  ;;  %v2047_v36 = vpop.f32.mrf.mxu1 }
  0xfa   :  { %v981_v37 = vadd.f32 %v965_v33, %v297_v15  ;;  %v937_v38 = vrot.slane %v233_v35, 1  ;;  %v1060_v50 = vrot.slane %v2047_v36, 1 }
  0xfb   :  { %v237_v39 = vpop.f32.mrf.mxu0  ;;  %v374_v40 = vpop.f32.mrf.mxu1 }
  0xfc   :  { %v1003_v41 = vsel %vm983_vm2, %v981_v37, -inf  ;;  %v961_v42 = vsel %vm949_vm1, %v936_v22, %v937_v38 }
  0xfd   :  { %v2053_v43 = vmax.f32 %v980_v34, %v1003_v41  ;;  %v969_v44 = vadd.f32 %v961_v42, %v225_v14  ;;  %v239_v45 = vpop.f32.mrf.mxu0  ;;  %v376_v46 = vpop.f32.mrf.mxu1 }
  0xfe   :  { %v938_v47 = vrot.slane %v239_v45, 1  ;;  %v1061_v48 = vrot.slane %v376_v46, 1 }
  0xff   :  { %v991_v49 = vsel %vm983_vm2, %v969_v44, -inf  ;;  %v243_v51 = vpop.f32.mrf.mxu0  ;;  %v380_v52 = vpop.f32.mrf.mxu1 }
 0x100   :  { %v2058_v53 = vmax.f32 %v968_v32, %v991_v49  ;;  %v960_v54 = vsel %vm949_vm1, %v937_v38, %v938_v47  ;;  %v1090_v56 = vsel %vm949_vm1, %v1060_v50, %v1061_v48 }
 0x101   :  { %v970_v55 = vadd.f32 %v960_v54, %v231_v26  ;;  %v245_v59 = vpop.f32.mrf.mxu0  ;;  %v382_v60 = vpop.f32.mrf.mxu1  ;;  %v2066_v61 = vadd.f32 %v1090_v56, %v368_v27 }
 0x102   :  { %v939_v62 = vrot.slane %v245_v59, 1  ;;  %v1062_v63 = vrot.slane %v382_v60, 1 }
 0x103   :  { %v249_v1 = vpop.f32.mrf.mxu0  ;;  %v386_v2 = vpop.f32.mrf.mxu1 }
 0x104   :  { %v959_v3 = vsel %vm949_vm1, %v938_v47, %v939_v62  ;;  %v1089_v4 = vsel %vm949_vm1, %v1061_v48, %v1062_v63 }
 0x105   :  { %v251_v5 = vpop.f32.mrf.mxu0  ;;  %v388_v6 = vpop.f32.mrf.mxu1  ;;  %v971_v8 = vadd.f32 %v959_v3, %v237_v39  ;;  %v2072_v9 = vadd.f32 %v1089_v4, %v374_v40 }
 0x106   :  { %v940_v10 = vrot.slane %v251_v5, 1  ;;  %v1063_v11 = vrot.slane %v388_v6, 1 }
 0x107   :  { %v255_v12 = vpop.f32.mrf.mxu0  ;;  %v392_v13 = vpop.f32.mrf.mxu1  ;;  %v993_v14 = vsel %vm983_vm2, %v971_v8, -inf }
 0x108   :  { %v958_v15 = vsel %vm949_vm1, %v939_v62, %v940_v10  ;;  %v2078_v16 = vmax.f32 %v970_v55, %v993_v14  ;;  %v1088_v18 = vsel %vm949_vm1, %v1062_v63, %v1063_v11 }
 0x109   :  { %v972_v17 = vadd.f32 %v958_v15, %v243_v51  ;;  %v257_v19 = vpop.f32.mrf.mxu0  ;;  %v394_v20 = vpop.f32.mrf.mxu1  ;;  %v2082_v21 = vadd.f32 %v1088_v18, %v380_v52 }
 0x10a   :  { %v941_v22 = vrot.slane %v257_v19, 1  ;;  %v1064_v23 = vrot.slane %v394_v20, 1 }
 0x10b   :  { %v261_v24 = vpop.f32.mrf.mxu0  ;;  %v398_v25 = vpop.f32.mrf.mxu1 }
 0x10c   :  { %v957_v26 = vsel %vm949_vm1, %v940_v10, %v941_v22  ;;  %v1087_v27 = vsel %vm949_vm1, %v1063_v11, %v1064_v23 }
 0x10d   :  { %v973_v30 = vadd.f32 %v957_v26, %v249_v1  ;;  %v2088_v31 = vadd.f32 %v1087_v27, %v386_v2  ;;  %v263_v32 = vpop.f32.mrf.mxu0  ;;  %v400_v33 = vpop.f32.mrf.mxu1 }
 0x10e   :  { %v942_v34 = vrot.slane %v263_v32, 1  ;;  %v1065_v35 = vrot.slane %v400_v33, 1 }
 0x10f   :  { %v995_v37 = vsel %vm983_vm2, %v973_v30, -inf  ;;  %v267_v38 = vpop.f32.mrf.mxu0  ;;  %v404_v39 = vpop.f32.mrf.mxu1 }
 0x110   :  { %v2092_v40 = vmax.f32 %v972_v17, %v995_v37  ;;  %v956_v41 = vsel %vm949_vm1, %v941_v22, %v942_v34  ;;  %v1086_v42 = vsel %vm949_vm1, %v1064_v23, %v1065_v35  ;;  %v1005_v22 = vrot.slane %v2037_v28, 4 }
 0x111   :  { %v974_v44 = vadd.f32 %v956_v41, %v255_v12  ;;  %v2098_v45 = vadd.f32 %v1086_v42, %v392_v13  ;;  %v269_v46 = vpop.f32.mrf.mxu0  ;;  %v406_v47 = vpop.f32.mrf.mxu1 }
 0x112   :  { %v943_v48 = vrot.slane %v269_v46, 1  ;;  %v1066_v49 = vrot.slane %v406_v47, 1  ;;  %v1012_v47 = vrot.slane %v2058_v53, 4 }
 0x113   :  { %v273_v51 = vpop.f32.mrf.mxu0  ;;  %v410_v52 = vpop.f32.mrf.mxu1 }
 0x114   :  { %v955_v54 = vsel %vm949_vm1, %v942_v34, %v943_v48  ;;  %v1085_v55 = vsel %vm949_vm1, %v1065_v35, %v1066_v49  ;;  %v1047_v35 = vrot.slane %v2039_v29, 4 }
 0x115   :  { %v975_v56 = vadd.f32 %v955_v54, %v261_v24  ;;  %v2104_v59 = vadd.f32 %v1085_v55, %v398_v25  ;;  %v275_v60 = vpop.f32.mrf.mxu0  ;;  %v412_v62 = vpop.f32.mrf.mxu1 }
 0x116   :  { %v944_v63 = vrot.slane %v275_v60, 1  ;;  %v1067_v1 = vrot.slane %v412_v62, 1 }
 0x117   :  { %v997_v2 = vsel %vm983_vm2, %v975_v56, -inf  ;;  %v416_v3 = vpop.f32.mrf.mxu1  ;;  %v2108_v4 = vpop.f32.mrf.mxu0 }
 0x118   :  { %v2110_v5 = vmax.f32 %v974_v44, %v997_v2  ;;  %v953_v6 = vsel %vm949_vm1, %v944_v63, %v945_v0  ;;  %v954_v8 = vsel %vm949_vm1, %v943_v48, %v944_v63  ;;  %v1084_v12 = vsel %vm949_vm1, %v1066_v49, %v1067_v1 }
 0x119   :  { %v976_v10 = vadd.f32 %v954_v8, %v267_v38  ;;  %v977_v11 = vadd.f32 %v953_v6, %v273_v51  ;;  %v418_v13 = vpop.f32.mrf.mxu1  ;;  %v2120_v14 = vpop.f32.mrf.mxu0  ;;  %v2122_v15 = vadd.f32 %v1084_v12, %v404_v39  ;;  %v1108_v23 = vrot.slane %v2108_v4, 2 }
 0x11a   :  { %v1068_v17 = vrot.slane %v418_v13, 1  ;;  %v1006_v39 = vmax.f32 %v2037_v28, %v1005_v22 }
 0x11b   :  { %v999_v57 = vsel %vm983_vm2, %v977_v11, -inf  ;;  %v422_v18 = vpop.f32.mrf.mxu1  ;;  %v535_v19 = vpop.f32.mrf.mxu0 }
 0x11c   :  { %v2127_v0 = vmax.f32 %v976_v10, %v999_v57  ;;  %v1083_v20 = vsel %vm949_vm1, %v1067_v1, %v1068_v17  ;;  %v1109_v25 = vrot.slane %v535_v19, 2  ;;  %v1007_v55 = vrot.slane %v1006_v39, 2 }
 0x11d   :  { %v2133_v24 = vadd.f32 %v1083_v20, %v410_v52  ;;  %v424_v26 = vpop.f32.mrf.mxu1  ;;  %v2135_v27 = vpop.f32.mrf.mxu0  ;;  %v1048_v52 = vmax.f32 %v2039_v29, %v1047_v35  ;;  %v1013_v1 = vmax.f32 %v2058_v53, %v1012_v47 }
 0x11e   :  { %v1069_v30 = vrot.slane %v424_v26, 1  ;;  %v1139_v32 = vsel %vm1124_vm3, %v1108_v23, %v1109_v25  ;;  %v1054_v26 = vrot.slane %v2053_v43, 4 }
 0x11f   :  { %v428_v33 = vpop.f32.mrf.mxu1  ;;  %v541_v34 = vpop.f32.mrf.mxu0  ;;  %v1141_v37 = vadd.f32 %v1139_v32, %v2066_v61  ;;  %v1049_v10 = vrot.slane %v1048_v52, 2  ;;  %v1014_v20 = vrot.slane %v1013_v1, 2 }
 0x120   :  { %v1082_v38 = vsel %vm949_vm1, %v1068_v17, %v1069_v30  ;;  %v1110_v42 = vrot.slane %v541_v34, 2  ;;  %v1008_v17 = vmax.f32 %v1006_v39, %v1007_v55 }
 0x121   :  { %v2146_v41 = vadd.f32 %v1082_v38, %v416_v3  ;;  %v430_v44 = vpop.f32.mrf.mxu1  ;;  %v2148_v46 = vpop.f32.mrf.mxu0 }
 0x122   :  { %v1070_v48 = vrot.slane %v430_v44, 1  ;;  %v1138_v49 = vsel %vm1124_vm3, %v1109_v25, %v1110_v42  ;;  %v1009_v39 = vrot.slane %v1008_v17, 1 }
 0x123   :  { %v434_v61 = vpop.f32.mrf.mxu1  ;;  %v547_v51 = vpop.f32.mrf.mxu0  ;;  %v1142_v28 = vadd.f32 %v1138_v49, %v2072_v9 }
 0x124   :  { %v1081_v54 = vsel %vm949_vm1, %v1069_v30, %v1070_v48  ;;  %v1111_v60 = vrot.slane %v547_v51, 2  ;;  %v1015_v51 = vmax.f32 %v1013_v1, %v1014_v20 }
 0x125   :  { %v2158_v56 = vadd.f32 %v1081_v54, %v422_v18  ;;  %v436_v62 = vpop.f32.mrf.mxu1  ;;  %v2160_v63 = vpop.f32.mrf.mxu0  ;;  %v1164_v2 = vsel %vm1158_vm4, %v1142_v28, -inf  ;;  %v1055_v54 = vmax.f32 %v2053_v43, %v1054_v26 }
 0x126   :  { %v1071_v3 = vrot.slane %v436_v62, 1  ;;  %v1179_v6 = vmax.f32 %v1141_v37, %v1164_v2  ;;  %v1137_v29 = vsel %vm1124_vm3, %v1110_v42, %v1111_v60  ;;  %v2179_v37 = vmax.f32 %v1048_v52, %v1049_v10 }
 0x127   :  { %v440_v9 = vpop.f32.mrf.mxu1  ;;  %v553_v8 = vpop.f32.mrf.mxu0  ;;  %v1143_v11 = vadd.f32 %v1137_v29, %v2082_v21  ;;  %v1019_v21 = vrot.slane %v2078_v16, 4  ;;  %v1033_v10 = vrot.slane %v2110_v5, 4 }
 0x128   :  { %v1080_v12 = vsel %vm949_vm1, %v1070_v48, %v1071_v3  ;;  %v1112_v13 = vrot.slane %v553_v8, 2  ;;  %v1180_v57 = vrot.slane %v1179_v6, 4  ;;  %v2197_v8 = vmax.f32 %v1008_v17, %v1009_v39 }
 0x129   :  { %v2170_v53 = vadd.f32 %v1080_v12, %v428_v33  ;;  %v442_v18 = vpop.f32.mrf.mxu1  ;;  %v2172_v19 = vpop.f32.mrf.mxu0  ;;  %v1020_v55 = vmax.f32 %v2078_v16, %v1019_v21  ;;  %v1051_v36 = vrot.slane %v2179_v37, 1 }
 0x12a   :  { %v1136_v22 = vsel %vm1124_vm3, %v1111_v60, %v1112_v13  ;;  %v1072_v25 = vrot.slane %v442_v18, 1  ;;  %v1181_v30 = vmax.f32 %v1179_v6, %v1180_v57 }
 0x12b   :  { %v1144_v32 = vadd.f32 %v1136_v22, %v2088_v31  ;;  %v446_v34 = vpop.f32.mrf.mxu1  ;;  %v559_v35 = vpop.f32.mrf.mxu0  ;;  %v1021_v20 = vrot.slane %v1020_v55, 2  ;;  %v1040_v22 = vrot.slane %v2127_v0, 4 }
 0x12c   :  { %v1079_v33 = vsel %vm949_vm1, %v1071_v3, %v1072_v25  ;;  %v1113_v38 = vrot.slane %v559_v35, 2  ;;  %v1182_v42 = vrot.slane %v1181_v30, 2 }
 0x12d   :  { %v1166_v44 = vsel %vm1158_vm4, %v1144_v32, -inf  ;;  %v2185_v47 = vadd.f32 %v1079_v33, %v434_v61  ;;  %v448_v48 = vpop.f32.mrf.mxu1  ;;  %v2187_v49 = vpop.f32.mrf.mxu0  ;;  %v1026_v61 = vrot.slane %v2092_v40, 4  ;;  %v1034_v33 = vmax.f32 %v2110_v5, %v1033_v10 }
 0x12e   :  { %v1186_v31 = vmax.f32 %v1143_v11, %v1166_v44  ;;  %v1135_v52 = vsel %vm1124_vm3, %v1112_v13, %v1113_v38  ;;  %v1073_v28 = vrot.slane %v448_v48, 1  ;;  %v1183_v60 = vmax.f32 %v1181_v30, %v1182_v42 }
 0x12f   :  { %v1145_v62 = vadd.f32 %v1135_v52, %v2098_v45  ;;  %v452_v2 = vpop.f32.mrf.mxu1  ;;  %v565_v3 = vpop.f32.mrf.mxu0  ;;  %v1016_v45 = vrot.slane %v1015_v51, 1  ;;  %v1041_v5 = vmax.f32 %v2127_v0, %v1040_v22 }
 0x130   :  { %v1187_v6 = vrot.slane %v1186_v31, 4  ;;  %v1078_v1 = vsel %vm949_vm1, %v1072_v25, %v1073_v28  ;;  %v1114_v29 = vrot.slane %v565_v3, 2  ;;  %v1184_v11 = vrot.slane %v1183_v60, 1 }
 0x131   :  { %v2200_v43 = vadd.f32 %v1078_v1, %v440_v9  ;;  %v454_v16 = vpop.f32.mrf.mxu1  ;;  %v2202_v12 = vpop.f32.mrf.mxu0  ;;  %v1027_v9 = vmax.f32 %v2092_v40, %v1026_v61 }
 0x132   :  { %v1188_v13 = vmax.f32 %v1186_v31, %v1187_v6  ;;  %v1134_v57 = vsel %vm1124_vm3, %v1113_v38, %v1114_v29  ;;  %v1074_v18 = vrot.slane %v454_v16, 1  ;;  %v2207_v25 = vmax.f32 %v1183_v60, %v1184_v11 }
 0x133   :  { %v1146_v17 = vadd.f32 %v1134_v57, %v2104_v59  ;;  %v458_v26 = vpop.f32.mrf.mxu1  ;;  %v571_v21 = vpop.f32.mrf.mxu0  ;;  %v2224_v60 = vmax.f32 %v1015_v51, %v1016_v45  ;;  %v1028_v45 = vrot.slane %v1027_v9, 2 }
 0x134   :  { %v1189_v30 = vrot.slane %v1188_v13, 2  ;;  %v1077_v32 = vsel %vm949_vm1, %v1073_v28, %v1074_v18  ;;  %v1115_v35 = vrot.slane %v571_v21, 2  ;;  %v1056_v28 = vrot.slane %v1055_v54, 2 }
 0x135   :  { %v1168_v39 = vsel %vm1158_vm4, %v1146_v17, -inf  ;;  %v2218_v42 = vadd.f32 %v1077_v32, %v446_v34  ;;  %v460_v59 = vpop.f32.mrf.mxu1  ;;  %v2220_v44 = vpop.f32.mrf.mxu0 }
 0x136   :  { %v1190_v48 = vmax.f32 %v1188_v13, %v1189_v30  ;;  %v1193_v40 = vmax.f32 %v1145_v62, %v1168_v39  ;;  %v1133_v31 = vsel %vm1124_vm3, %v1114_v29, %v1115_v35  ;;  %v1075_v52 = vrot.slane %v460_v59, 1 }
 0x137   :  { %v1147_v3 = vadd.f32 %v1133_v31, %v2122_v15  ;;  %v577_v61 = vpop.f32.mrf.mxu0  ;;  %v2228_v6 = vpop.f32.mrf.mxu1  ;;  %v1022_v29 = vmax.f32 %v1020_v55, %v1021_v20  ;;  %v1035_v13 = vrot.slane %v1034_v33, 2  ;;  %v1057_v22 = vmax.f32 %v1055_v54, %v1056_v28 }
 0x138   :  { %v1191_v34 = vrot.slane %v1190_v48, 1  ;;  %v1194_v1 = vrot.slane %v1193_v40, 4  ;;  %v1076_v10 = vsel %vm949_vm1, %v1074_v18, %v1075_v52  ;;  %v1091_v62 = vsel %vm949_vm1, %v1075_v52, %v1060_v50 }
 0x139   :  { %v2236_v51 = vadd.f32 %v1076_v10, %v452_v2  ;;  %v2238_v11 = vadd.f32 %v1091_v62, %v458_v26  ;;  %v1116_v0 = vrot.slane %v577_v61, 2  ;;  %v2240_v15 = vpop.f32.mrf.mxu0  ;;  %v2242_v16 = vpop.f32.mrf.mxu1  ;;  %v1042_v20 = vrot.slane %v1041_v5, 2 }
 0x13a   :  { %v2244_v57 = vmax.f32 %v1190_v48, %v1191_v34  ;;  %v1195_v18 = vmax.f32 %v1193_v40, %v1194_v1  ;;  %v1023_v30 = vrot.slane %v1022_v29, 1  ;;  %v1029_v48 = vmax.f32 %v1027_v9, %v1028_v45 }
 0x13b   :  { %v1132_v50 = vsel %vm1124_vm3, %v1115_v35, %v1116_v0  ;;  %v583_v55 = vpop.f32.mrf.mxu0  ;;  %v696_v2 = vpop.f32.mrf.mxu1  ;;  %v1036_v54 = vmax.f32 %v1034_v33, %v1035_v13  ;;  %v2259_v61 = vmax.f32 %v2179_v37, %v1051_v36  ;;  %v1043_v34 = vmax.f32 %v1041_v5, %v1042_v20 }
 0x13c   :  { %v1196_v26 = vrot.slane %v1195_v18, 2  ;;  %v1148_v21 = vadd.f32 %v1132_v50, %v2133_v24  ;;  %v1117_v32 = vrot.slane %v583_v55, 2  ;;  %v1058_v10 = vrot.slane %v1057_v22, 1 }
 0x13d   :  { %v2252_v39 = vpop.f32.mrf.mxu0  ;;  %v2254_v59 = vpop.f32.mrf.mxu1  ;;  %v2261_v62 = vmax.f32 %v1022_v29, %v1023_v30  ;;  %v1244_v33 = vrot.slane %v696_v2, 1  ;;  %v2570_v29 = vrot.slane %v2228_v6, 1  ;;  %v1044_v2 = vrot.slane %v1043_v34, 1 }
 0x13e   :  { %v1197_v40 = vmax.f32 %v1195_v18, %v1196_v26  ;;  %v1170_v35 = vsel %vm1158_vm4, %v1148_v21, -inf  ;;  %v1131_v9 = vsel %vm1124_vm3, %v1116_v0, %v1117_v32  ;;  %v1037_v18 = vrot.slane %v1036_v54, 1 }
 0x13f   :  { %v1200_v31 = vmax.f32 %v1147_v3, %v1170_v35  ;;  %v589_v52 = vpop.f32.mrf.mxu0  ;;  %v702_v28 = vpop.f32.mrf.mxu1  ;;  %v1030_v3 = vrot.slane %v1029_v48, 1  ;;  %v1149_v30 = vadd.f32 %v1131_v9, %v2146_v41  ;;  %v2291_v9 = vmax.f32 %v1057_v22, %v1058_v10 }
 0x140   :  { %v1198_v24 = vrot.slane %v1197_v40, 1  ;;  %v1118_v1 = vrot.slane %v589_v52, 2  ;;  %v1245_v20 = vrot.slane %v702_v28, 1 }
 0x141   :  { %v1201_v50 = vrot.slane %v1200_v31, 4  ;;  %v2265_v45 = vpop.f32.mrf.mxu0  ;;  %v2267_v13 = vpop.f32.mrf.mxu1 }
 0x142   :  { %v2269_v55 = vmax.f32 %v1197_v40, %v1198_v24  ;;  %v1130_v37 = vsel %vm1124_vm3, %v1117_v32, %v1118_v1  ;;  %v1292_v40 = vrot.slane %v2254_v59, 2  ;;  %v1273_v32 = vsel %vm949_vm1, %v2570_v29, %v1244_v33 }
 0x143   :  { %v1202_v5 = vmax.f32 %v1200_v31, %v1201_v50  ;;  %v1150_v36 = vadd.f32 %v1130_v37, %v2158_v56  ;;  %v595_v26 = vpop.f32.mrf.mxu0  ;;  %v708_v0 = vpop.f32.mrf.mxu1  ;;  %v2287_v24 = vmax.f32 %v1029_v48, %v1030_v3  ;;  %v2289_v50 = vmax.f32 %v1036_v54, %v1037_v18 }
 0x144   :  { %v1119_v31 = vrot.slane %v595_v26, 2  ;;  %v2571_v37 = vrot.slane %v2242_v16, 2  ;;  %v1272_v21 = vsel %vm949_vm1, %v1244_v33, %v1245_v20  ;;  %v1246_v29 = vrot.slane %v708_v0, 1 }
 0x145   :  { %v1203_v35 = vrot.slane %v1202_v5, 2  ;;  %v1172_v56 = vsel %vm1158_vm4, %v1150_v36, -inf  ;;  %v2285_v52 = vpop.f32.mrf.mxu0  ;;  %v710_v28 = vpop.f32.mrf.mxu1  ;;  %v2296_v26 = vmax.f32 %v1043_v34, %v1044_v2  ;;  %v1275_v38 = vadd.f32 %v1273_v32, %v2120_v14 }
 0x146   :  { %v1207_v41 = vmax.f32 %v1149_v30, %v1172_v56  ;;  %v1321_v22 = vsel %vm1124_vm3, %v2571_v37, %v1292_v40  ;;  %v1129_v10 = vsel %vm1124_vm3, %v1118_v1, %v1119_v31  ;;  %v1276_v34 = vadd.f32 %v1272_v21, %v2135_v27 }
 0x147   :  { %v1204_v59 = vmax.f32 %v1202_v5, %v1203_v35  ;;  %v601_v17 = vpop.f32.mrf.mxu0  ;;  %v714_v36 = vpop.f32.mrf.mxu1  ;;  %v1293_v14 = vrot.slane %v2267_v13, 2  ;;  %v1271_v30 = vsel %vm949_vm1, %v1245_v20, %v1246_v29  ;;  %v1294_v35 = vrot.slane %v710_v28, 2 }
 0x148   :  { %v1208_v48 = vrot.slane %v1207_v41, 4  ;;  %v1120_v3 = vrot.slane %v601_v17, 2  ;;  %v1247_v18 = vrot.slane %v714_v36, 1 }
 0x149   :  { %v1205_v54 = vrot.slane %v1204_v59, 1  ;;  %v2305_v33 = vpop.f32.mrf.mxu0  ;;  %v716_v5 = vpop.f32.mrf.mxu1 }
 0x14a   :  { %v1209_v0 = vmax.f32 %v1207_v41, %v1208_v48  ;;  %v1128_v17 = vsel %vm1124_vm3, %v1119_v31, %v1120_v3  ;;  %v1151_v41 = vadd.f32 %v1129_v10, %v2170_v53  ;;  %v1270_v27 = vsel %vm949_vm1, %v1246_v29, %v1247_v18 }
 0x14b   :  { %v2311_v2 = vmax.f32 %v1204_v59, %v1205_v54  ;;  %v1152_v1 = vadd.f32 %v1128_v17, %v2185_v47  ;;  %v607_v32 = vpop.f32.mrf.mxu0  ;;  %v720_v56 = vpop.f32.mrf.mxu1  ;;  %v1295_v13 = vrot.slane %v716_v5, 2  ;;  %v1320_v54 = vsel %vm1124_vm3, %v1292_v40, %v1293_v14 }
 0x14c   :  { %v1210_v36 = vrot.slane %v1209_v0, 2  ;;  %v1121_v59 = vrot.slane %v607_v32, 2  ;;  %v1248_v20 = vrot.slane %v720_v56, 1  ;;  %v1277_v53 = vadd.f32 %v1271_v30, %v2148_v46 }
 0x14d   :  { %v1174_v31 = vsel %vm1158_vm4, %v1152_v1, -inf  ;;  %v2323_v28 = vpop.f32.mrf.mxu0  ;;  %v722_v47 = vpop.f32.mrf.mxu1  ;;  %v1319_v29 = vsel %vm1124_vm3, %v1293_v14, %v1294_v35  ;;  %v1278_v5 = vadd.f32 %v1270_v27, %v2160_v63  ;;  %v2337_v46 = vadd.f32 %v1320_v54, %v1276_v34 }
 0x14e   :  { %v1211_v48 = vmax.f32 %v1209_v0, %v1210_v36  ;;  %v1214_v10 = vmax.f32 %v1151_v41, %v1174_v31  ;;  %v1269_v17 = vsel %vm949_vm1, %v1247_v18, %v1248_v20  ;;  %v1296_v1 = vrot.slane %v722_v47, 2 }
 0x14f   :  { %v613_v32 = vpop.f32.mrf.mxu0  ;;  %v726_v56 = vpop.f32.mrf.mxu1  ;;  %v1318_v0 = vsel %vm1124_vm3, %v1294_v35, %v1295_v13  ;;  %v2335_v36 = vadd.f32 %v1321_v22, %v1275_v38  ;;  %v1127_v14 = vsel %vm1124_vm3, %v1120_v3, %v1121_v59  ;;  %v1279_v31 = vadd.f32 %v1269_v17, %v2172_v19 }
 0x150   :  { %v1212_v21 = vrot.slane %v1211_v48, 1  ;;  %v1215_v37 = vrot.slane %v1214_v10, 4  ;;  %v1122_v40 = vrot.slane %v613_v32, 2  ;;  %v1249_v63 = vrot.slane %v726_v56, 1 }
 0x151   :  { %v2341_v30 = vpop.f32.mrf.mxu0  ;;  %v728_v18 = vpop.f32.mrf.mxu1  ;;  %v2349_v22 = vadd.f32 %v1319_v29, %v1277_v53  ;;  %v2351_v34 = vadd.f32 %v1318_v0, %v1278_v5  ;;  %v1317_v3 = vsel %vm1124_vm3, %v1295_v13, %v1296_v1 }
 0x152   :  { %v2344_v41 = vmax.f32 %v1211_v48, %v1212_v21  ;;  %v1216_v27 = vmax.f32 %v1214_v10, %v1215_v37  ;;  %v1126_v38 = vsel %vm1124_vm3, %v1121_v59, %v1122_v40  ;;  %v1153_v21 = vadd.f32 %v1127_v14, %v2200_v43 }
 0x153   :  { %v1154_v35 = vadd.f32 %v1126_v38, %v2218_v42  ;;  %v619_v47 = vpop.f32.mrf.mxu0  ;;  %v732_v54 = vpop.f32.mrf.mxu1  ;;  %v1268_v59 = vsel %vm949_vm1, %v1248_v20, %v1249_v63  ;;  %v1297_v53 = vrot.slane %v728_v18, 2  ;;  %v2365_v5 = vadd.f32 %v1317_v3, %v1279_v31 }
 0x154   :  { %v1217_v32 = vrot.slane %v1216_v27, 2  ;;  %v1123_v37 = vrot.slane %v619_v47, 2  ;;  %v1250_v48 = vrot.slane %v732_v54, 1  ;;  %v1280_v3 = vadd.f32 %v1268_v59, %v2187_v49 }
 0x155   :  { %v1176_v19 = vsel %vm1158_vm4, %v1154_v35, -inf  ;;  %v2361_v10 = vpop.f32.mrf.mxu0  ;;  %v734_v29 = vpop.f32.mrf.mxu1  ;;  %v1316_v4 = vsel %vm1124_vm3, %v1296_v1, %v1297_v53 }
 0x156   :  { %v1218_v13 = vmax.f32 %v1216_v27, %v1217_v32  ;;  %v1221_v17 = vmax.f32 %v1153_v21, %v1176_v19  ;;  %v1125_v43 = vsel %vm1124_vm3, %v1122_v40, %v1123_v37  ;;  %v1140_v56 = vsel %vm1124_vm3, %v1123_v37, %v1108_v23 }
 0x157   :  { %v1155_v20 = vadd.f32 %v1125_v43, %v2236_v51  ;;  %v1267_v0 = vsel %vm949_vm1, %v1249_v63, %v1250_v48  ;;  %v1298_v14 = vrot.slane %v734_v29, 2  ;;  %v738_v18 = vpop.f32.mrf.mxu1  ;;  %v1624_v38 = vpop.f32.mrf.mxu0  ;;  %v1156_v35 = vadd.f32 %v1140_v56, %v2238_v11 }
 0x158   :  { %v1219_v27 = vrot.slane %v1218_v13, 1  ;;  %v1222_v31 = vrot.slane %v1221_v17, 4  ;;  %v1281_v40 = vadd.f32 %v1267_v0, %v2202_v12  ;;  %v1251_v23 = vrot.slane %v738_v18, 1 }
 0x159   :  { %v1340_v47 = vrot.slane %v1624_v38, 3  ;;  %v740_v51 = vpop.f32.mrf.mxu1  ;;  %v2381_v54 = vpop.f32.mrf.mxu0  ;;  %v1178_v49 = vsel %vm1158_vm4, %v1156_v35, -inf  ;;  %v1315_v11 = vsel %vm1124_vm3, %v1297_v53, %v1298_v14 }
 0x15a   :  { %v2384_v63 = vmax.f32 %v1218_v13, %v1219_v27  ;;  %v1223_v32 = vmax.f32 %v1221_v17, %v1222_v31  ;;  %v1228_v21 = vmax.f32 %v1155_v20, %v1178_v49  ;;  %v1266_v12 = vsel %vm949_vm1, %v1250_v48, %v1251_v23 }
 0x15b   :  { %v1299_v1 = vrot.slane %v740_v51, 2  ;;  %v1339_v37 = vrot.slane %v2381_v54, 3  ;;  %v744_v19 = vpop.f32.mrf.mxu1  ;;  %v1627_v59 = vpop.f32.mrf.mxu0  ;;  %v1282_v13 = vadd.f32 %v1266_v12, %v2220_v44  ;;  %v2402_v27 = vadd.f32 %v1316_v4, %v1280_v3 }
 0x15c   :  { %v1224_v29 = vrot.slane %v1223_v32, 2  ;;  %v1252_v43 = vrot.slane %v744_v19, 1  ;;  %v1342_v17 = vrot.slane %v1627_v59, 3  ;;  %v1229_v56 = vrot.slane %v1228_v21, 4 }
 0x15d   :  { %v1314_v0 = vsel %vm1124_vm3, %v1298_v14, %v1299_v1  ;;  %v1370_v53 = vsel %vm1355_vm5, %v1339_v37, %v1340_v47  ;;  %v746_v48 = vpop.f32.mrf.mxu1  ;;  %v861_v20 = vpop.f32.mrf.mxu0  ;;  %v2404_v44 = vadd.f32 %v1315_v11, %v1281_v40 }
 0x15e   :  { %v1225_v38 = vmax.f32 %v1223_v32, %v1224_v29  ;;  %v1265_v31 = vsel %vm949_vm1, %v1251_v23, %v1252_v43  ;;  %v1230_v35 = vmax.f32 %v1228_v21, %v1229_v56  ;;  %v1300_v51 = vrot.slane %v746_v48, 2 }
 0x15f   :  { %v1283_v14 = vadd.f32 %v1265_v31, %v2240_v15  ;;  %v1341_v49 = vrot.slane %v861_v20, 3  ;;  %v750_v12 = vpop.f32.mrf.mxu1  ;;  %v1630_v19 = vpop.f32.mrf.mxu0  ;;  %v2409_v59 = vadd.f32 %v1314_v0, %v1282_v13  ;;  %v1372_v42 = vadd.f32 %v1370_v53, %v2335_v36 }
 0x160   :  { %v1253_v18 = vrot.slane %v750_v12, 1  ;;  %v1344_v32 = vrot.slane %v1630_v19, 3  ;;  %v1231_v3 = vrot.slane %v1230_v35, 2  ;;  %v1313_v4 = vsel %vm1124_vm3, %v1299_v1, %v1300_v51 }
 0x161   :  { %v1368_v40 = vsel %vm1355_vm5, %v1341_v49, %v1342_v17  ;;  %v1369_v15 = vsel %vm1355_vm5, %v1340_v47, %v1341_v49  ;;  %v752_v23 = vpop.f32.mrf.mxu1  ;;  %v871_v11 = vpop.f32.mrf.mxu0  ;;  %v1226_v21 = vrot.slane %v1225_v38, 1  ;;  %v2418_v29 = vadd.f32 %v1313_v4, %v1283_v14 }
 0x162   :  { %v1373_v13 = vadd.f32 %v1369_v15, %v2337_v46  ;;  %v1264_v36 = vsel %vm949_vm1, %v1252_v43, %v1253_v18  ;;  %v1374_v56 = vadd.f32 %v1368_v40, %v2349_v22  ;;  %v1301_v0 = vrot.slane %v752_v23, 2 }
 0x163   :  { %v1284_v1 = vadd.f32 %v1264_v36, %v2252_v39  ;;  %v1343_v53 = vrot.slane %v871_v11, 3  ;;  %v756_v48 = vpop.f32.mrf.mxu1  ;;  %v1633_v20 = vpop.f32.mrf.mxu0  ;;  %v1232_v31 = vmax.f32 %v1230_v35, %v1231_v3  ;;  %v2438_v40 = vmax.f32 %v1225_v38, %v1226_v21 }
 0x164   :  { %v1395_v47 = vsel %vm1389_vm6, %v1373_v13, -inf  ;;  %v1254_v49 = vrot.slane %v756_v48, 1  ;;  %v1346_v14 = vrot.slane %v1633_v20, 3  ;;  %v1312_v46 = vsel %vm1124_vm3, %v1300_v51, %v1301_v0 }
 0x165   :  { %v1410_v12 = vmax.f32 %v1372_v42, %v1395_v47  ;;  %v1366_v43 = vsel %vm1355_vm5, %v1343_v53, %v1344_v32  ;;  %v1367_v39 = vsel %vm1355_vm5, %v1342_v17, %v1343_v53  ;;  %v758_v22 = vpop.f32.mrf.mxu1  ;;  %v881_v19 = vpop.f32.mrf.mxu0  ;;  %v2433_v4 = vadd.f32 %v1312_v46, %v1284_v1 }
 0x166   :  { %v1375_v35 = vadd.f32 %v1367_v39, %v2351_v34  ;;  %v1263_v3 = vsel %vm949_vm1, %v1253_v18, %v1254_v49  ;;  %v1302_v15 = vrot.slane %v758_v22, 2  ;;  %v1345_v23 = vrot.slane %v881_v19, 3 }
 0x167   :  { %v1411_v42 = vrot.slane %v1410_v12, 4  ;;  %v1285_v51 = vadd.f32 %v1263_v3, %v2265_v45  ;;  %v762_v11 = vpop.f32.mrf.mxu1  ;;  %v2441_v13 = vpop.f32.mrf.mxu0  ;;  %v1376_v17 = vadd.f32 %v1366_v43, %v2365_v5  ;;  %v1233_v46 = vrot.slane %v1232_v31, 1 }
 0x168   :  { %v1397_v36 = vsel %vm1389_vm6, %v1375_v35, -inf  ;;  %v1255_v1 = vrot.slane %v762_v11, 1  ;;  %v1348_v34 = vrot.slane %v2441_v13, 3  ;;  %v1311_v38 = vsel %vm1124_vm3, %v1301_v0, %v1302_v15 }
 0x169   :  { %v1412_v53 = vmax.f32 %v1410_v12, %v1411_v42  ;;  %v1417_v18 = vmax.f32 %v1374_v56, %v1397_v36  ;;  %v1364_v45 = vsel %vm1355_vm5, %v1345_v23, %v1346_v14  ;;  %v764_v21 = vpop.f32.mrf.mxu1  ;;  %v891_v48 = vpop.f32.mrf.mxu0  ;;  %v2451_v20 = vadd.f32 %v1311_v38, %v1285_v51 }
 0x16a   :  { %v1365_v5 = vsel %vm1355_vm5, %v1344_v32, %v1345_v23  ;;  %v1262_v47 = vsel %vm949_vm1, %v1254_v49, %v1255_v1  ;;  %v1378_v0 = vadd.f32 %v1364_v45, %v2404_v44  ;;  %v1303_v35 = vrot.slane %v764_v21, 2 }
 0x16b   :  { %v1413_v43 = vrot.slane %v1412_v53, 2  ;;  %v1418_v12 = vrot.slane %v1417_v18, 4  ;;  %v1377_v56 = vadd.f32 %v1365_v5, %v2402_v27  ;;  %v768_v39 = vpop.f32.mrf.mxu1  ;;  %v2459_v22 = vpop.f32.mrf.mxu0  ;;  %v1286_v19 = vadd.f32 %v1262_v47, %v2285_v52 }
 0x16c   :  { %v1347_v3 = vrot.slane %v891_v48, 3  ;;  %v1256_v42 = vrot.slane %v768_v39, 1  ;;  %v1350_v23 = vrot.slane %v2459_v22, 3  ;;  %v1310_v44 = vsel %vm1124_vm3, %v1302_v15, %v1303_v35 }
 0x16d   :  { %v1414_v51 = vmax.f32 %v1412_v53, %v1413_v43  ;;  %v1419_v32 = vmax.f32 %v1417_v18, %v1418_v12  ;;  %v1399_v49 = vsel %vm1389_vm6, %v1377_v56, -inf  ;;  %v770_v11 = vpop.f32.mrf.mxu1  ;;  %v901_v13 = vpop.f32.mrf.mxu0  ;;  %v2469_v52 = vmax.f32 %v1232_v31, %v1233_v46 }
 0x16e   :  { %v1424_v27 = vmax.f32 %v1376_v17, %v1399_v49  ;;  %v1363_v36 = vsel %vm1355_vm5, %v1346_v14, %v1347_v3  ;;  %v1362_v53 = vsel %vm1355_vm5, %v1347_v3, %v1348_v34  ;;  %v1334_v17 = vadd.f32 %v1310_v44, %v1286_v19 }
 0x16f   :  { %v1415_v38 = vrot.slane %v1414_v51, 1  ;;  %v1420_v45 = vrot.slane %v1419_v32, 2  ;;  %v1379_v18 = vadd.f32 %v1363_v36, %v2409_v59  ;;  %v774_v21 = vpop.f32.mrf.mxu1  ;;  %v2474_v48 = vpop.f32.mrf.mxu0  ;;  %v1261_v15 = vsel %vm949_vm1, %v1255_v1, %v1256_v42 }
 0x170   :  { %v1425_v5 = vrot.slane %v1424_v27, 4  ;;  %v1304_v47 = vrot.slane %v770_v11, 2  ;;  %v1287_v46 = vadd.f32 %v1261_v15, %v2305_v33  ;;  %v1349_v22 = vrot.slane %v901_v13, 3 }
 0x171   :  { %v1416_v43 = vmax.f32 %v1414_v51, %v1415_v38  ;;  %v1421_v14 = vmax.f32 %v1419_v32, %v1420_v45  ;;  %v1401_v31 = vsel %vm1389_vm6, %v1379_v18, -inf  ;;  %v2481_v12 = vpop.f32.mrf.mxu1  ;;  %v911_v19 = vpop.f32.mrf.mxu0  ;;  %v2572_v1 = vmax.f32 %v2197_v8, %v2207_v25 }
 0x172   :  { %v1426_v56 = vmax.f32 %v1424_v27, %v1425_v5  ;;  %v1431_v59 = vmax.f32 %v1378_v0, %v1401_v31  ;;  %v1309_v39 = vsel %vm1124_vm3, %v1303_v35, %v1304_v47  ;;  %v1380_v32 = vadd.f32 %v1362_v53, %v2418_v29 }
 0x173   :  { %v2488_v3 = vmax.f32 %v2572_v1, %v1416_v43  ;;  %v1422_v51 = vrot.slane %v1421_v14, 1  ;;  %v1257_v49 = vrot.slane %v774_v21, 1  ;;  %v2491_v44 = vadd.f32 %v1309_v39, %v1287_v46  ;;  %v780_v25 = vpop.f32.mrf.mxu1  ;;  %v1645_v53 = vpop.f32.mrf.mxu0 }
 0x174   :  { %v1427_v11 = vrot.slane %v1426_v56, 2  ;;  %v1432_v33 = vrot.slane %v1431_v59, 4  ;;  %v1361_v0 = vsel %vm1355_vm5, %v1348_v34, %v1349_v22  ;;  %v1360_v35 = vsel %vm1355_vm5, %v1349_v22, %v1350_v23 }
 0x175   :  { %v1423_v27 = vmax.f32 %v1421_v14, %v1422_v51  ;;  %v1381_v13 = vadd.f32 %v1361_v0, %v2433_v4  ;;  %v1260_v8 = vsel %vm949_vm1, %v1256_v42, %v1257_v49  ;;  %v1352_v45 = vrot.slane %v2474_v48, 3 }
 0x176   :  { %v1428_v36 = vmax.f32 %v1426_v56, %v1427_v11  ;;  %v1433_v29 = vmax.f32 %v1431_v59, %v1432_v33  ;;  %v1288_v38 = vadd.f32 %v1260_v8, %v2323_v28  ;;  %v2573_v34 = vmax.f32 %v2224_v60, %v2244_v57  ;;  %v782_v59 = vpop.f32.mrf.mxu1 }
 0x177   :  { %v1403_v21 = vsel %vm1389_vm6, %v1381_v13, -inf  ;;  %v1305_v4 = vrot.slane %v2481_v12, 2  ;;  %v1351_v5 = vrot.slane %v911_v19, 3  ;;  %v1258_v14 = vrot.slane %v780_v25, 1 }
 0x178   :  { %v1467_v18 = vmax.f32 %v2573_v34, %v1423_v27  ;;  %v1429_v42 = vrot.slane %v1428_v36, 1  ;;  %v1434_v15 = vrot.slane %v1433_v29, 2  ;;  %v1438_v43 = vmax.f32 %v1380_v32, %v1403_v21 }
 0x179   :  { %v1382_v28 = vadd.f32 %v1360_v35, %v2451_v20  ;;  %v1308_v48 = vsel %vm1124_vm3, %v1304_v47, %v1305_v4  ;;  %v1359_v60 = vsel %vm1355_vm5, %v1350_v23, %v1351_v5  ;;  %v1354_v57 = vrot.slane %v1645_v53, 3  ;;  %v921_v23 = vpop.f32.mrf.mxu0 }
 0x17a   :  { %v1430_v31 = vmax.f32 %v1428_v36, %v1429_v42  ;;  %v1435_v46 = vmax.f32 %v1433_v29, %v1434_v15  ;;  %v1439_v56 = vrot.slane %v1438_v43, 4  ;;  %v1358_v12 = vsel %vm1355_vm5, %v1351_v5, %v1352_v45 }
 0x17b   :  { %v1336_v39 = vadd.f32 %v1308_v48, %v1288_v38  ;;  %v1383_v22 = vadd.f32 %v1359_v60, %v1334_v17  ;;  %v1259_v20 = vsel %vm949_vm1, %v1257_v49, %v1258_v14  ;;  %v2574_v19 = vrot.slane %v2228_v6, 1 }
 0x17c   :  { %v2575_v1 = vmax.f32 %v2261_v62, %v2269_v55  ;;  %v1436_v32 = vrot.slane %v1435_v46, 1  ;;  %v1440_v11 = vmax.f32 %v1438_v43, %v1439_v56  ;;  %v1289_v33 = vadd.f32 %v1259_v20, %v2341_v30 }
 0x17d   :  { %v1274_v47 = vsel %vm949_vm1, %v1258_v14, %v2574_v19  ;;  %v1405_v17 = vsel %vm1389_vm6, %v1383_v22, -inf  ;;  %v1371_v6 = vsel %vm1355_vm5, %v1354_v57, %v1339_v37  ;;  %v1306_v49 = vrot.slane %v782_v59, 2 }
 0x17e   :  { %v1468_v51 = vmax.f32 %v2575_v1, %v1430_v31  ;;  %v1290_v0 = vadd.f32 %v1274_v47, %v2361_v10  ;;  %v1437_v27 = vmax.f32 %v1435_v46, %v1436_v32  ;;  %v1441_v35 = vrot.slane %v1440_v11, 2 }
 0x17f   :  { %v1445_v13 = vmax.f32 %v1382_v28, %v1405_v17  ;;  %v1353_v62 = vrot.slane %v921_v23, 3  ;;  %v1307_v55 = vsel %vm1124_vm3, %v1305_v4, %v1306_v49  ;;  %v2576_v30 = vrot.slane %v2242_v16, 2 }
 0x180   :  { %v1241_v10 = vmax.f32 %v2259_v61, %v2438_v40  ;;  %v1242_v54 = vmax.f32 %v2291_v9, %v2469_v52  ;;  %v1442_v37 = vmax.f32 %v1440_v11, %v1441_v35  ;;  %v1337_v36 = vadd.f32 %v1307_v55, %v1289_v33 }
 0x181   :  { %v1322_v8 = vsel %vm1124_vm3, %v1306_v49, %v2576_v30  ;;  %v1446_v25 = vrot.slane %v1445_v13, 4  ;;  %v1356_v38 = vsel %vm1355_vm5, %v1353_v62, %v1354_v57  ;;  %v1357_v53 = vsel %vm1355_vm5, %v1352_v45, %v1353_v62 }
 0x182   :  { %v1338_v29 = vadd.f32 %v1322_v8, %v1290_v0  ;;  %v2577_v16 = vmax.f32 %v2287_v24, %v2311_v2  ;;  %v1483_v61 = vsel %vm1482_vm7, %v1467_v18, %v2488_v3  ;;  %v1443_v40 = vrot.slane %v1442_v37, 1 }
 0x183   :  { %v1447_v21 = vmax.f32 %v1445_v13, %v1446_v25  ;;  %v1385_v52 = vadd.f32 %v1357_v53, %v1336_v39  ;;  %v1384_v4 = vadd.f32 %v1358_v12, %v2491_v44  ;;  %v1386_v5 = vadd.f32 %v1356_v38, %v1337_v36 }
 0x184   :  { %v1469_v34 = vmax.f32 %v2577_v16, %v1437_v27  ;;  %v1387_v9 = vadd.f32 %v1371_v6, %v1338_v29  ;;  %v1485_v42 = vsel %vm1484_vm8, %v1468_v51, %v1483_v61  ;;  %v1444_v15 = vmax.f32 %v1442_v37, %v1443_v40 }
 0x185   :  { %v1448_v43 = vrot.slane %v1447_v21, 2  ;;  %v1407_v58 = vsel %vm1389_vm6, %v1385_v52, -inf  ;;  %v2578_v44 = vmax.f32 %v2289_v50, %v2344_v41  ;;  %v2579_v59 = vmax.f32 %v2296_v26, %v2384_v63 }
 0x186   :  { %v1409_v24 = vsel %vm1389_vm6, %v1387_v9, -inf  ;;  %v1452_v2 = vmax.f32 %v1384_v4, %v1407_v58  ;;  %v1487_v3 = vsel %vm1486_vm9, %v1469_v34, %v1485_v42 }
 0x187   :  { %v1459_v45 = vmax.f32 %v1386_v5, %v1409_v24  ;;  %v1449_v18 = vmax.f32 %v1447_v21, %v1448_v43  ;;  %v1470_v14 = vmax.f32 %v2578_v44, %v1444_v15 }
 0x188   :  { %v1453_v28 = vrot.slane %v1452_v2, 4 }
 0x189   :  { %v1460_v48 = vrot.slane %v1459_v45, 4  ;;  %v1450_v60 = vrot.slane %v1449_v18, 1  ;;  %v1489_v57 = vsel %vm1488_vm10, %v1470_v14, %v1487_v3 }
 0x18a   :  { %v1454_v31 = vmax.f32 %v1452_v2, %v1453_v28 }
 0x18b   :  { %v1461_v46 = vmax.f32 %v1459_v45, %v1460_v48  ;;  %v1451_v56 = vmax.f32 %v1449_v18, %v1450_v60 }
 0x18c   :  { %v1455_v12 = vrot.slane %v1454_v31, 2 }
 0x18d   :  { %v1462_v7 = vrot.slane %v1461_v46, 2  ;;  %v1471_v39 = vmax.f32 %v2579_v59, %v1451_v56 }
 0x18e   :  { %v1456_v22 = vmax.f32 %v1454_v31, %v1455_v12 }
 0x18f   :  { %v1463_v20 = vmax.f32 %v1461_v46, %v1462_v7  ;;  %v1491_v19 = vsel %vm1490_vm11, %v1471_v39, %v1489_v57 }
 0x190   :  { %v1457_v47 = vrot.slane %v1456_v22, 1 }
 0x191   :  { %v1464_v50 = vrot.slane %v1463_v20, 1 }
 0x192   :  { %v1458_v41 = vmax.f32 %v1456_v22, %v1457_v47 }
 0x193   :  { %v1465_v23 = vmax.f32 %v1463_v20, %v1464_v50 }
 0x194   :  { %v1472_v1 = vmax.f32 %v1241_v10, %v1458_v41 }
 0x195   :  { %v1473_v51 = vmax.f32 %v1242_v54, %v1465_v23 }
 0x196   :  { %v1493_v32 = vsel %vm1492_vm12, %v1472_v1, %v1491_v19 }
 0x197   :  { %v1495_v11 = vsel %vm1494_vm13, %v1473_v51, %v1493_v32 }
 0x198   :  { %1497 = vst [vmem:[#allocation7] sm:$0xff] %v1495_v11 }
 0x199   :  { %1713 = shalt.err (!%p1710_p0)
}
 0x19a   :  { %1507 = dma.vmem_to_hbm [thread:$0]  %s1505_s1, 128, %s2569_s2, [#allocation4]  }
 0x19b   :  { %1726 = dma.done.wait [#allocation4], 128  }
 0x19c   :  { %1727 = vsyncadd [#allocation4], 4294967168 }
 0x19d   :  { %1511 = vsyncpa [#allocation3], 1 }
 0x19e   :  { %1512 = vsyncpa [#allocation6], 1 }
 0x19f   :  { %1513 = vsyncpa [#allocation4], 1 }

// kernel: tpu_custom_call.1
= control target key start
LH: loop header
LB: loop body
LE: loop exit
PB: predicated region body
PF: predicated region fallthrough
CT: control target
= control target key end

     0   :  { %7 = vsyncpa [#allocation3], 0  ;;  %s2567_s0 = inlined_call_operand.hbm [shape: f32[8,16,32], index: 0, kind: input, shape index: {}]   ;;  %s2568_s1 = inlined_call_operand.hbm [shape: f32[32,1152], index: 1, kind: input, shape index: {}]   ;;  %s2569_s2 = inlined_call_operand.hbm [shape: f32[8,128], index: 2, kind: output, shape index: {}]  }
   0x1   :  { %8 = vsyncpa [#allocation6], 0 }
   0x2   :  { %9 = vsyncpa [#allocation4], 0  ;;  %s1728_s9 = smov [#allocation2]  }
   0x3   :  { %s15_s10 = sshll.u32 %s1728_s9, 4  ;;  %s16_s10 = int_to_ptr.vmem [resolvable:$true] %s15_s10 }
   0x4   :  { %s1670_s11 = scalar_lea.vmem %s16_s10, 2048  ;;  %p1675_p1 = scmp.lt.s32.totalorder %s16_s10, %s16_s10 }
   0x5   :  { %p1671_p0 = scmp.ne.s32.totalorder %s16_s10, %s1670_s11  ;;  %p1676_p2 = scmp.lt.s32.totalorder %s1670_s11, %s1670_s11 }
   0x7   :  { %p1677_p3 = por %p1676_p2, %p1675_p1 }
   0x9   :  { %p1678_p4 = pnand %p1677_p3, %p1671_p0 }
   0xb   :  { %1681 = shalt.err (!%p1678_p4)
}
   0xc   :  { %s1729_s12 = smov 128   ;;  %s1730_s13 = smov 8  }
   0xd   :  { %21 = dma.hbm_to_vmem [thread:$0]  %s2567_s0, 2048, %s16_s10, [#allocation3], %s1729_s12, %s1729_s12, %s1730_s13  }
   0xe   :  { %s1731_s16 = smov [#allocation5]  }
   0xf   :  { %s27_s17 = sshll.u32 %s1731_s16, 4  ;;  %s28_s17 = int_to_ptr.vmem [resolvable:$true] %s27_s17 }
  0x10   :  { %s1690_s18 = scalar_lea.vmem %s28_s17, 4608  ;;  %p1695_p6 = scmp.lt.s32.totalorder %s28_s17, %s28_s17 }
  0x11   :  { %p1691_p5 = scmp.ne.s32.totalorder %s28_s17, %s1690_s18  ;;  %p1696_p7 = scmp.lt.s32.totalorder %s1690_s18, %s1690_s18 }
  0x13   :  { %p1697_p8 = por %p1696_p7, %p1695_p6 }
  0x15   :  { %p1698_p9 = pnand %p1697_p8, %p1691_p5 }
  0x17   :  { %1701 = shalt.err (!%p1698_p9)
}
  0x18   :  { %s1732_s19 = smov 1152   ;;  %s1733_s20 = smov 72  }
  0x19   :  { %33 = dma.hbm_to_vmem [thread:$0]  %s2568_s1, 4608, %s28_s17, [#allocation6], %s1732_s19, %s1732_s19, %s1733_s20  }
  0x1a   :  { %1722 = dma.done.wait [#allocation3], 2048  }
  0x1b   :  { %1723 = vsyncadd [#allocation3], 4294965248 }
  0x1c   :  { %1724 = dma.done.wait [#allocation6], 4608  }
  0x1d   :  { %1725 = vsyncadd [#allocation6], 4294962688  ;;  %v1734_v0 = vmov 0.0   ;;  %v84_v1 = vld [vmem:[#allocation5 + $0xe0] sm:$0xff]  ;;  %v83_v2 = vld [vmem:[#allocation5 + $0xd8] sm:$0xff]  ;;  %vm92_vm0 = vcmask 261120   ;;  %v930_v53 = vlaneseq }
  0x1e   :  { %205 = vmatprep.mubr.f32.mxu0 %v1734_v0  ;;  %277 = vmatprep.mubr.f32.mxu1 %v1734_v0  ;;  %v75_v3 = vld [vmem:[#allocation5 + $0x98] sm:$0xff]  ;;  %v74_v4 = vld [vmem:[#allocation5 + $0x90] sm:$0xff]  ;;  %v65_v6 = vld [vmem:[#allocation5 + $0x48] sm:$0xff]  ;;  %vm1482_vm7 = vcmask 1041409   ;;  %vm1484_vm8 = vcmask 1042434   ;;  %vm1486_vm9 = vcmask 1043459  }
  0x1f   :  { %165 = vmatprep.subr.mxu0 %v84_v1  ;;  %1646 = vmatprep.subr.mxu1 %v84_v1  ;;  %v66_v5 = vld [vmem:[#allocation5 + $0x50] sm:$0xff]  ;;  %v57_v7 = vld [vmem:[#allocation5 + $0x8] sm:$0xff]  ;;  %v56_v8 = vld [vmem:[#allocation5] sm:$0xff]  ;;  %v2015_v58 = vshrl.u32 %v930_v53, 7  ;;  %vm1488_vm10 = vcmask 1044484   ;;  %vm1490_vm11 = vcmask 1045509  }
  0x20   :  { %166 = vmatpush1.msra.mxu0 %v83_v2  ;;  %1650 = vmatpush1.msra.mxu1 %v83_v2  ;;  %v1759_v9 = vld [vmem:[#allocation2] sm:$0xff]  ;;  %v86_v11 = vld [vmem:[#allocation5 + $0xf0] sm:$0xff]  ;;  %v85_v13 = vld [vmem:[#allocation5 + $0xe8] sm:$0xff]  ;;  %vm1492_vm12 = vcmask 1046534   ;;  %s1735_s0 = smov [#allocation7]   ;;  %vm1494_vm13 = vcmask 1047559  }
  0x21   :  { %167 = vmatprep.subr.mxu0 %v75_v3  ;;  %1647 = vmatprep.subr.mxu1 %v75_v3  ;;  %v1761_v10 = vld [vmem:[#allocation2 + $0x60] sm:$0xff]  ;;  %v87_v14 = vld [vmem:[#allocation5 + $0xf8] sm:$0xff]  ;;  %v1767_v15 = vld [vmem:[#allocation2 + $0x8] sm:$0xff]  ;;  %vm949_vm1 = vcmp.lt.s32.totalorder %v2015_v58, 7  ;;  %vm1124_vm3 = vcmp.lt.s32.totalorder %v2015_v58, 6  ;;  %vm1355_vm5 = vcmp.lt.s32.totalorder %v2015_v58, 5 }
  0x22   :  { %168 = vmatpush1.msra.mxu0 %v74_v4  ;;  %1651 = vmatpush1.msra.mxu1 %v74_v4  ;;  %v88_v12 = vld [vmem:[#allocation5 + $0x100] sm:$0xff]  ;;  %v1769_v16 = vld [vmem:[#allocation2 + $0x68] sm:$0xff]  ;;  %v79_v20 = vld [vmem:[#allocation5 + $0xb8] sm:$0xff]  ;;  %s1504_s1 = sshll.u32 %s1735_s0, 4  ;;  %s1505_s1 = int_to_ptr.vmem [resolvable:$true] %s1504_s1 }
  0x23   :  { %169 = vmatprep.subr.mxu0 %v66_v5  ;;  %1648 = vmatprep.subr.mxu1 %v66_v5  ;;  %v77_v17 = vld [vmem:[#allocation5 + $0xa8] sm:$0xff]  ;;  %v76_v18 = vld [vmem:[#allocation5 + $0xa0] sm:$0xff]  ;;  %v1778_v21 = vld [vmem:[#allocation2 + $0x10] sm:$0xff]  ;;  %s1702_s23 = scalar_lea.vmem %s1505_s1, 128  ;;  %p1707_p11 = scmp.lt.s32.totalorder %s1505_s1, %s1505_s1 }
  0x24   :  { %170 = vmatpush1.msra.mxu0 %v65_v6  ;;  %1652 = vmatpush1.msra.mxu1 %v65_v6  ;;  %v68_v19 = vld [vmem:[#allocation5 + $0x60] sm:$0xff]  ;;  %v1780_v22 = vld [vmem:[#allocation2 + $0x70] sm:$0xff]  ;;  %v67_v23 = vld [vmem:[#allocation5 + $0x58] sm:$0xff]  ;;  %p1703_p10 = scmp.ne.s32.totalorder %s1505_s1, %s1702_s23  ;;  %p1708_p12 = scmp.lt.s32.totalorder %s1702_s23, %s1702_s23 }
  0x25   :  { %171 = vmatprep.subr.mxu0 %v57_v7  ;;  %1649 = vmatprep.subr.mxu1 %v57_v7  ;;  %v59_v24 = vld [vmem:[#allocation5 + $0x18] sm:$0xff]  ;;  %v58_v25 = vld [vmem:[#allocation5 + $0x10] sm:$0xff]  ;;  %v69_v31 = vld [vmem:[#allocation5 + $0x68] sm:$0xff]  ;;  %v2026_v7 = vadd.s32 8, %v2015_v58 }
  0x26   :  { %172 = vmatpush1.msra.mxu0 %v56_v8  ;;  %1653 = vmatpush1.msra.mxu1 %v56_v8  ;;  %v78_v26 = vld [vmem:[#allocation5 + $0xb0] sm:$0xff]  ;;  %v1788_v27 = vld [vmem:[#allocation2 + $0x18] sm:$0xff]  ;;  %v1799_v32 = vld [vmem:[#allocation2 + $0x20] sm:$0xff]  ;;  %p1709_p13 = por %p1708_p12, %p1707_p11 }
  0x27   :  { %1514 = vmatmul.mubr.msk.f32.vlgmr.msra.gmra.mxu0 %vm92_vm0, %v1759_v9  ;;  %1526 = vmatmul.mubr.msk.f32.vlgmr.msra.gmra.mxu1 %vm92_vm0, %v1761_v10  ;;  %v1790_v28 = vld [vmem:[#allocation2 + $0x78] sm:$0xff]  ;;  %v90_v29 = vld [vmem:[#allocation5 + $0x110] sm:$0xff]  ;;  %v89_v33 = vld [vmem:[#allocation5 + $0x108] sm:$0xff]  ;;  %vm983_vm2 = vcmp.lt.s32.totalorder %v2026_v7, 15  ;;  %vm1158_vm4 = vcmp.lt.s32.totalorder %v2026_v7, 14  ;;  %vm1389_vm6 = vcmp.lt.s32.totalorder %v2026_v7, 13 }
  0x28   :  { %326 = vmatprep.subr.mxu1 %v86_v11  ;;  %487 = vmatprep.subr.mxu0 %v88_v12  ;;  %v70_v30 = vld [vmem:[#allocation5 + $0x70] sm:$0xff]  ;;  %v81_v34 = vld [vmem:[#allocation5 + $0xc8] sm:$0xff]  ;;  %v80_v35 = vld [vmem:[#allocation5 + $0xc0] sm:$0xff]  ;;  %p1710_p0 = pnand %p1709_p13, %p1703_p10 }
  0x29   :  { %327 = vmatpush1.msra.mxu1 %v85_v13  ;;  %488 = vmatpush1.msra.mxu0 %v87_v14  ;;  %v61_v36 = vld [vmem:[#allocation5 + $0x28] sm:$0xff]  ;;  %v60_v38 = vld [vmem:[#allocation5 + $0x20] sm:$0xff]  ;;  %v71_v40 = vld [vmem:[#allocation5 + $0x78] sm:$0xff] }
  0x2a   :  { %211 = vmatprep.mubr.f32.mxu0 %v1734_v0  ;;  %283 = vmatprep.mubr.f32.mxu1 %v1734_v0  ;;  %v1806_v37 = vld [vmem:[#allocation2 + $0x28] sm:$0xff]  ;;  %v72_v39 = vld [vmem:[#allocation5 + $0x80] sm:$0xff]  ;;  %v91_v41 = vld [vmem:[#allocation5 + $0x118] sm:$0xff] }
  0x2b   :  { %1515 = vmatmul.mubr.msk.f32.gmra.mxu0 %vm92_vm0, %v1767_v15  ;;  %1527 = vmatmul.mubr.msk.f32.gmra.mxu1 %vm92_vm0, %v1769_v16  ;;  %v1815_v42 = vld [vmem:[#allocation2 + $0x30] sm:$0xff]  ;;  %v63_v43 = vld [vmem:[#allocation5 + $0x38] sm:$0xff]  ;;  %v1831_v46 = vld [vmem:[#allocation2 + $0x40] sm:$0xff] }
  0x2c   :  { %328 = vmatprep.subr.mxu1 %v77_v17  ;;  %217 = vmatprep.mubr.f32.mxu0 %v1734_v0  ;;  %v62_v44 = vld [vmem:[#allocation5 + $0x30] sm:$0xff]  ;;  %v1823_v45 = vld [vmem:[#allocation2 + $0x38] sm:$0xff]  ;;  %v1839_v47 = vld [vmem:[#allocation2 + $0x48] sm:$0xff] }
  0x2d   :  { %329 = vmatpush1.msra.mxu1 %v76_v18  ;;  %289 = vmatprep.mubr.f32.mxu1 %v1734_v0  ;;  %v1847_v48 = vld [vmem:[#allocation2 + $0x50] sm:$0xff]  ;;  %v1855_v49 = vld [vmem:[#allocation2 + $0x58] sm:$0xff]  ;;  %v73_v51 = vld [vmem:[#allocation5 + $0x88] sm:$0xff] }
  0x2e   :  { %330 = vmatprep.subr.mxu1 %v68_v19  ;;  %489 = vmatprep.subr.mxu0 %v79_v20  ;;  %v82_v50 = vld [vmem:[#allocation5 + $0xd0] sm:$0xff]  ;;  %v64_v52 = vld [vmem:[#allocation5 + $0x40] sm:$0xff] }
  0x2f   :  { %1516 = vmatmul.mubr.msk.f32.gmra.mxu0 %vm92_vm0, %v1778_v21  ;;  %1528 = vmatmul.mubr.msk.f32.gmra.mxu1 %vm92_vm0, %v1780_v22 }
  0x30   :  { %331 = vmatpush1.msra.mxu1 %v67_v23  ;;  %223 = vmatprep.mubr.f32.mxu0 %v1734_v0 }
  0x31   :  { %295 = vmatprep.mubr.f32.mxu1 %v1734_v0  ;;  %332 = vmatprep.subr.mxu1 %v59_v24 }
  0x32   :  { %333 = vmatpush1.msra.mxu1 %v58_v25  ;;  %490 = vmatpush1.msra.mxu0 %v78_v26 }
  0x33   :  { %1517 = vmatmul.mubr.msk.f32.gmra.mxu0 %vm92_vm0, %v1788_v27  ;;  %1529 = vmatmul.mubr.msk.f32.gmra.mxu1 %vm92_vm0, %v1790_v28 }
  0x34   :  { %229 = vmatprep.mubr.f32.mxu0 %v1734_v0  ;;  %366 = vmatprep.mubr.f32.mxu1 %v1734_v0 }
  0x35   :  { %648 = vmatprep.subr.mxu1 %v90_v29  ;;  %491 = vmatprep.subr.mxu0 %v70_v30 }
  0x36   :  { %492 = vmatpush1.msra.mxu0 %v69_v31 }
  0x37   :  { %1518 = vmatmul.mubr.msk.f32.gmra.mxu0 %vm92_vm0, %v1799_v32  ;;  %1530 = vmatmul.mubr.msk.f32.vlgmr.msra.gmra.mxu1 %vm92_vm0, %v1759_v9 }
  0x38   :  { %649 = vmatpush1.msra.mxu1 %v89_v33  ;;  %235 = vmatprep.mubr.f32.mxu0 %v1734_v0 }
  0x39   :  { %372 = vmatprep.mubr.f32.mxu1 %v1734_v0  ;;  %650 = vmatprep.subr.mxu1 %v81_v34 }
  0x3a   :  { %651 = vmatpush1.msra.mxu1 %v80_v35  ;;  %493 = vmatprep.subr.mxu0 %v61_v36 }
  0x3b   :  { %1519 = vmatmul.mubr.msk.f32.gmra.mxu0 %vm92_vm0, %v1806_v37  ;;  %1531 = vmatmul.mubr.msk.f32.gmra.mxu1 %vm92_vm0, %v1767_v15 }
  0x3c   :  { %241 = vmatprep.mubr.f32.mxu0 %v1734_v0  ;;  %378 = vmatprep.mubr.f32.mxu1 %v1734_v0 }
  0x3d   :  { %494 = vmatpush1.msra.mxu0 %v60_v38  ;;  %652 = vmatprep.subr.mxu1 %v72_v39 }
  0x3e   :  { %653 = vmatpush1.msra.mxu1 %v71_v40  ;;  %1614 = vmatprep.subr.mxu0 %v91_v41 }
  0x3f   :  { %1520 = vmatmul.mubr.msk.f32.gmra.mxu0 %vm92_vm0, %v1815_v42  ;;  %1532 = vmatmul.mubr.msk.f32.gmra.mxu1 %vm92_vm0, %v1778_v21 }
  0x40   :  { %247 = vmatprep.mubr.f32.mxu0 %v1734_v0  ;;  %384 = vmatprep.mubr.f32.mxu1 %v1734_v0 }
  0x41   :  { %654 = vmatprep.subr.mxu1 %v63_v43 }
  0x42   :  { %655 = vmatpush1.msra.mxu1 %v62_v44 }
  0x43   :  { %1521 = vmatmul.mubr.msk.f32.gmra.mxu0 %vm92_vm0, %v1823_v45  ;;  %1533 = vmatmul.mubr.msk.f32.gmra.mxu1 %vm92_vm0, %v1788_v27 }
  0x44   :  { %253 = vmatprep.mubr.f32.mxu0 %v1734_v0  ;;  %390 = vmatprep.mubr.f32.mxu1 %v1734_v0 }
  0x47   :  { %1522 = vmatmul.mubr.msk.f32.gmra.mxu0 %vm92_vm0, %v1831_v46  ;;  %1534 = vmatmul.mubr.msk.f32.gmra.mxu1 %vm92_vm0, %v1799_v32 }
  0x48   :  { %259 = vmatprep.mubr.f32.mxu0 %v1734_v0  ;;  %396 = vmatprep.mubr.f32.mxu1 %v1734_v0 }
  0x4b   :  { %1523 = vmatmul.mubr.msk.f32.gmra.mxu0 %vm92_vm0, %v1839_v47  ;;  %1535 = vmatmul.mubr.msk.f32.gmra.mxu1 %vm92_vm0, %v1806_v37 }
  0x4c   :  { %265 = vmatprep.mubr.f32.mxu0 %v1734_v0  ;;  %402 = vmatprep.mubr.f32.mxu1 %v1734_v0 }
  0x4f   :  { %1524 = vmatmul.mubr.msk.f32.gmra.mxu0 %vm92_vm0, %v1847_v48  ;;  %1536 = vmatmul.mubr.msk.f32.gmra.mxu1 %vm92_vm0, %v1815_v42 }
  0x50   :  { %271 = vmatprep.mubr.f32.mxu0 %v1734_v0  ;;  %408 = vmatprep.mubr.f32.mxu1 %v1734_v0 }
  0x53   :  { %1525 = vmatmul.mubr.msk.f32.gmra.mxu0 %vm92_vm0, %v1855_v49  ;;  %1537 = vmatmul.mubr.msk.f32.gmra.mxu1 %vm92_vm0, %v1823_v45 }
  0x54   :  { %414 = vmatprep.mubr.f32.mxu1 %v1734_v0  ;;  %527 = vmatprep.mubr.f32.mxu0 %v1734_v0 }
  0x57   :  { %1538 = vmatmul.mubr.msk.f32.gmra.mxu1 %vm92_vm0, %v1831_v46  ;;  %1546 = vmatmul.mubr.msk.f32.vlgmr.msra.gmra.mxu0 %vm92_vm0, %v1759_v9 }
  0x58   :  { %1615 = vmatpush3.msra.mxu0 %v91_v41  ;;  %420 = vmatprep.mubr.f32.mxu1 %v1734_v0 }
  0x59   :  { %533 = vmatprep.mubr.f32.mxu0 %v1734_v0  ;;  %1616 = vmatprep.subr.mxu0 %v82_v50 }
  0x5a   :  { %1617 = vmatpush3.msra.mxu0 %v82_v50 }
  0x5b   :  { %1539 = vmatmul.mubr.msk.f32.gmra.mxu1 %vm92_vm0, %v1839_v47  ;;  %1547 = vmatmul.mubr.msk.f32.gmra.mxu0 %vm92_vm0, %v1767_v15 }
  0x5c   :  { %426 = vmatprep.mubr.f32.mxu1 %v1734_v0  ;;  %539 = vmatprep.mubr.f32.mxu0 %v1734_v0 }
  0x5d   :  { %1618 = vmatprep.subr.mxu0 %v73_v51 }
  0x5e   :  { %1619 = vmatpush3.msra.mxu0 %v73_v51 }
  0x5f   :  { %1540 = vmatmul.mubr.msk.f32.gmra.mxu1 %vm92_vm0, %v1847_v48  ;;  %1548 = vmatmul.mubr.msk.f32.gmra.mxu0 %vm92_vm0, %v1778_v21 }
  0x60   :  { %432 = vmatprep.mubr.f32.mxu1 %v1734_v0  ;;  %545 = vmatprep.mubr.f32.mxu0 %v1734_v0 }
  0x61   :  { %1620 = vmatprep.subr.mxu0 %v64_v52 }
  0x62   :  { %1621 = vmatpush3.msra.mxu0 %v64_v52 }
  0x63   :  { %1541 = vmatmul.mubr.msk.f32.gmra.mxu1 %vm92_vm0, %v1855_v49  ;;  %1549 = vmatmul.mubr.msk.f32.gmra.mxu0 %vm92_vm0, %v1788_v27 }
  0x64   :  { %438 = vmatprep.mubr.f32.mxu1 %v1734_v0  ;;  %551 = vmatprep.mubr.f32.mxu0 %v1734_v0 }
  0x67   :  { %1542 = vmatmul.mubr.msk.f32.gmra.mxu1 %vm92_vm0, %v1761_v10  ;;  %1550 = vmatmul.mubr.msk.f32.gmra.mxu0 %vm92_vm0, %v1799_v32 }
  0x68   :  { %444 = vmatprep.mubr.f32.mxu1 %v1734_v0  ;;  %557 = vmatprep.mubr.f32.mxu0 %v1734_v0 }
  0x6b   :  { %1543 = vmatmul.mubr.msk.f32.gmra.mxu1 %vm92_vm0, %v1769_v16  ;;  %1551 = vmatmul.mubr.msk.f32.gmra.mxu0 %vm92_vm0, %v1806_v37 }
  0x6c   :  { %450 = vmatprep.mubr.f32.mxu1 %v1734_v0  ;;  %563 = vmatprep.mubr.f32.mxu0 %v1734_v0 }
  0x6f   :  { %1544 = vmatmul.mubr.msk.f32.gmra.mxu1 %vm92_vm0, %v1780_v22  ;;  %1552 = vmatmul.mubr.msk.f32.gmra.mxu0 %vm92_vm0, %v1815_v42 }
  0x70   :  { %456 = vmatprep.mubr.f32.mxu1 %v1734_v0  ;;  %569 = vmatprep.mubr.f32.mxu0 %v1734_v0 }
  0x73   :  { %1545 = vmatmul.mubr.msk.f32.gmra.mxu1 %vm92_vm0, %v1790_v28  ;;  %1553 = vmatmul.mubr.msk.f32.gmra.mxu0 %vm92_vm0, %v1823_v45 }
  0x74   :  { %575 = vmatprep.mubr.f32.mxu0 %v1734_v0  ;;  %688 = vmatprep.mubr.f32.mxu1 %v1734_v0 }
  0x77   :  { %1554 = vmatmul.mubr.msk.f32.gmra.mxu0 %vm92_vm0, %v1831_v46  ;;  %1562 = vmatmul.mubr.msk.f32.vlgmr.msra.gmra.mxu1 %vm92_vm0, %v1759_v9 }
  0x78   :  { %581 = vmatprep.mubr.f32.mxu0 %v1734_v0  ;;  %694 = vmatprep.mubr.f32.mxu1 %v1734_v0 }
  0x7b   :  { %1555 = vmatmul.mubr.msk.f32.gmra.mxu0 %vm92_vm0, %v1839_v47  ;;  %1563 = vmatmul.mubr.msk.f32.gmra.mxu1 %vm92_vm0, %v1767_v15 }
  0x7c   :  { %587 = vmatprep.mubr.f32.mxu0 %v1734_v0  ;;  %700 = vmatprep.mubr.f32.mxu1 %v1734_v0 }
  0x7f   :  { %1556 = vmatmul.mubr.msk.f32.gmra.mxu0 %vm92_vm0, %v1847_v48  ;;  %1564 = vmatmul.mubr.msk.f32.gmra.mxu1 %vm92_vm0, %v1778_v21 }
  0x80   :  { %593 = vmatprep.mubr.f32.mxu0 %v1734_v0  ;;  %706 = vmatprep.mubr.f32.mxu1 %v1734_v0 }
  0x83   :  { %1557 = vmatmul.mubr.msk.f32.gmra.mxu0 %vm92_vm0, %v1855_v49  ;;  %1565 = vmatmul.mubr.msk.f32.gmra.mxu1 %vm92_vm0, %v1788_v27 }
  0x84   :  { %599 = vmatprep.mubr.f32.mxu0 %v1734_v0  ;;  %712 = vmatprep.mubr.f32.mxu1 %v1734_v0 }
  0x87   :  { %1558 = vmatmul.mubr.msk.f32.gmra.mxu0 %vm92_vm0, %v1761_v10  ;;  %1566 = vmatmul.mubr.msk.f32.gmra.mxu1 %vm92_vm0, %v1799_v32 }
  0x88   :  { %605 = vmatprep.mubr.f32.mxu0 %v1734_v0  ;;  %718 = vmatprep.mubr.f32.mxu1 %v1734_v0 }
  0x8b   :  { %1559 = vmatmul.mubr.msk.f32.gmra.mxu0 %vm92_vm0, %v1769_v16  ;;  %1567 = vmatmul.mubr.msk.f32.gmra.mxu1 %vm92_vm0, %v1806_v37 }
  0x8c   :  { %611 = vmatprep.mubr.f32.mxu0 %v1734_v0  ;;  %724 = vmatprep.mubr.f32.mxu1 %v1734_v0 }
  0x8f   :  { %1560 = vmatmul.mubr.msk.f32.gmra.mxu0 %vm92_vm0, %v1780_v22  ;;  %1568 = vmatmul.mubr.msk.f32.gmra.mxu1 %vm92_vm0, %v1815_v42 }
  0x90   :  { %617 = vmatprep.mubr.f32.mxu0 %v1734_v0  ;;  %730 = vmatprep.mubr.f32.mxu1 %v1734_v0 }
  0x93   :  { %1561 = vmatmul.mubr.msk.f32.gmra.mxu0 %vm92_vm0, %v1790_v28  ;;  %1569 = vmatmul.mubr.msk.f32.gmra.mxu1 %vm92_vm0, %v1823_v45 }
  0x94   :  { %736 = vmatprep.mubr.f32.mxu1 %v1734_v0  ;;  %1622 = vmatprep.mubr.msk.f32.mxu0 %vm92_vm0, %v1759_v9 }
  0x97   :  { %1570 = vmatmul.mubr.msk.f32.gmra.mxu1 %vm92_vm0, %v1831_v46  ;;  %1623 = vmatmul.mubr.msk.f32.vlgmr.msra.gmra.mxu0 %vm92_vm0, %v1767_v15 }
  0x98   :  { %742 = vmatprep.mubr.f32.mxu1 %v1734_v0  ;;  %1625 = vmatprep.mubr.msk.f32.mxu0 %vm92_vm0, %v1778_v21 }
  0x9b   :  { %1571 = vmatmul.mubr.msk.f32.gmra.mxu1 %vm92_vm0, %v1839_v47  ;;  %1626 = vmatmul.mubr.msk.f32.gmra.mxu0 %vm92_vm0, %v1788_v27 }
  0x9c   :  { %748 = vmatprep.mubr.f32.mxu1 %v1734_v0  ;;  %1628 = vmatprep.mubr.msk.f32.mxu0 %vm92_vm0, %v1799_v32 }
  0x9f   :  { %1572 = vmatmul.mubr.msk.f32.gmra.mxu1 %vm92_vm0, %v1847_v48  ;;  %1629 = vmatmul.mubr.msk.f32.gmra.mxu0 %vm92_vm0, %v1806_v37 }
  0xa0   :  { %754 = vmatprep.mubr.f32.mxu1 %v1734_v0  ;;  %1631 = vmatprep.mubr.msk.f32.mxu0 %vm92_vm0, %v1815_v42 }
  0xa3   :  { %1573 = vmatmul.mubr.msk.f32.gmra.mxu1 %vm92_vm0, %v1855_v49  ;;  %1632 = vmatmul.mubr.msk.f32.gmra.mxu0 %vm92_vm0, %v1823_v45 }
  0xa4   :  { %760 = vmatprep.mubr.f32.mxu1 %v1734_v0  ;;  %1634 = vmatprep.mubr.msk.f32.mxu0 %vm92_vm0, %v1831_v46 }
  0xa7   :  { %1574 = vmatmul.mubr.msk.f32.gmra.mxu1 %vm92_vm0, %v1761_v10  ;;  %1635 = vmatmul.mubr.msk.f32.gmra.mxu0 %vm92_vm0, %v1839_v47 }
  0xa8   :  { %766 = vmatprep.mubr.f32.mxu1 %v1734_v0  ;;  %1637 = vmatprep.mubr.msk.f32.mxu0 %vm92_vm0, %v1847_v48 }
  0xab   :  { %1575 = vmatmul.mubr.msk.f32.gmra.mxu1 %vm92_vm0, %v1769_v16  ;;  %1638 = vmatmul.mubr.msk.f32.gmra.mxu0 %vm92_vm0, %v1855_v49 }
  0xac   :  { %772 = vmatprep.mubr.f32.mxu1 %v1734_v0  ;;  %1640 = vmatprep.mubr.msk.f32.mxu0 %vm92_vm0, %v1761_v10 }
  0xaf   :  { %1576 = vmatmul.mubr.msk.f32.gmra.mxu1 %vm92_vm0, %v1780_v22  ;;  %1641 = vmatmul.mubr.msk.f32.gmra.mxu0 %vm92_vm0, %v1769_v16 }
  0xb0   :  { %778 = vmatprep.mubr.f32.mxu1 %v1734_v0  ;;  %1643 = vmatprep.mubr.msk.f32.mxu0 %vm92_vm0, %v1780_v22 }
  0xb3   :  { %1577 = vmatmul.mubr.msk.f32.gmra.mxu1 %vm92_vm0, %v1790_v28  ;;  %1644 = vmatmul.mubr.msk.f32.gmra.mxu0 %vm92_vm0, %v1790_v28 }
  0xe7   :  { %v207_v54 = vpop.f32.mrf.mxu0  ;;  %v279_v55 = vpop.f32.mrf.mxu1 }
  0xe9   :  { %v209_v56 = vpop.f32.mrf.mxu0  ;;  %v2013_v57 = vpop.f32.mrf.mxu1 }
  0xea   :  { %v933_v63 = vrot.slane %v209_v56, 1  ;;  %v945_v0 = vrot.slane %v2013_v57, 1 }
  0xeb   :  { %v213_v59 = vpop.f32.mrf.mxu0  ;;  %v285_v60 = vpop.f32.mrf.mxu1 }
  0xed   :  { %v215_v61 = vpop.f32.mrf.mxu0  ;;  %v287_v62 = vpop.f32.mrf.mxu1 }
  0xee   :  { %v934_v1 = vrot.slane %v215_v61, 1  ;;  %v946_v2 = vrot.slane %v287_v62, 1 }
  0xef   :  { %v219_v3 = vpop.f32.mrf.mxu0  ;;  %v291_v4 = vpop.f32.mrf.mxu1 }
  0xf0   :  { %v964_v5 = vsel %vm949_vm1, %v933_v63, %v934_v1  ;;  %v952_v6 = vsel %vm949_vm1, %v945_v0, %v946_v2 }
  0xf1   :  { %v966_v8 = vadd.f32 %v964_v5, %v207_v54  ;;  %v978_v9 = vadd.f32 %v952_v6, %v279_v55  ;;  %v221_v10 = vpop.f32.mrf.mxu0  ;;  %v293_v11 = vpop.f32.mrf.mxu1 }
  0xf2   :  { %v935_v12 = vrot.slane %v221_v10, 1  ;;  %v947_v13 = vrot.slane %v293_v11, 1 }
  0xf3   :  { %v225_v14 = vpop.f32.mrf.mxu0  ;;  %v297_v15 = vpop.f32.mrf.mxu1 }
  0xf4   :  { %v963_v16 = vsel %vm949_vm1, %v934_v1, %v935_v12  ;;  %v951_v17 = vsel %vm949_vm1, %v946_v2, %v947_v13 }
  0xf5   :  { %v967_v18 = vadd.f32 %v963_v16, %v213_v59  ;;  %v979_v19 = vadd.f32 %v951_v17, %v285_v60  ;;  %v227_v20 = vpop.f32.mrf.mxu0  ;;  %v299_v21 = vpop.f32.mrf.mxu1 }
  0xf6   :  { %v936_v22 = vrot.slane %v227_v20, 1  ;;  %v948_v23 = vrot.slane %v299_v21, 1 }
  0xf7   :  { %v989_v24 = vsel %vm983_vm2, %v967_v18, -inf  ;;  %v1001_v25 = vsel %vm983_vm2, %v979_v19, -inf  ;;  %v231_v26 = vpop.f32.mrf.mxu0  ;;  %v368_v27 = vpop.f32.mrf.mxu1 }
  0xf8   :  { %v2037_v28 = vmax.f32 %v966_v8, %v989_v24  ;;  %v2039_v29 = vmax.f32 %v978_v9, %v1001_v25  ;;  %v962_v30 = vsel %vm949_vm1, %v935_v12, %v936_v22  ;;  %v950_v31 = vsel %vm949_vm1, %v947_v13, %v948_v23 }
  0xf9   :  { %v968_v32 = vadd.f32 %v962_v30, %v219_v3  ;;  %v965_v33 = vsel %vm949_vm1, %v948_v23, %v933_v63  ;;  %v980_v34 = vadd.f32 %v950_v31, %v291_v4  ;;  %v233_v35 = vpop.f32.mrf.mxu0  ;;  %v2047_v36 = vpop.f32.mrf.mxu1 }
  0xfa   :  { %v981_v37 = vadd.f32 %v965_v33, %v297_v15  ;;  %v937_v38 = vrot.slane %v233_v35, 1  ;;  %v1060_v50 = vrot.slane %v2047_v36, 1 }
  0xfb   :  { %v237_v39 = vpop.f32.mrf.mxu0  ;;  %v374_v40 = vpop.f32.mrf.mxu1 }
  0xfc   :  { %v1003_v41 = vsel %vm983_vm2, %v981_v37, -inf  ;;  %v961_v42 = vsel %vm949_vm1, %v936_v22, %v937_v38 }
  0xfd   :  { %v2053_v43 = vmax.f32 %v980_v34, %v1003_v41  ;;  %v969_v44 = vadd.f32 %v961_v42, %v225_v14  ;;  %v239_v45 = vpop.f32.mrf.mxu0  ;;  %v376_v46 = vpop.f32.mrf.mxu1 }
  0xfe   :  { %v938_v47 = vrot.slane %v239_v45, 1  ;;  %v1061_v48 = vrot.slane %v376_v46, 1 }
  0xff   :  { %v991_v49 = vsel %vm983_vm2, %v969_v44, -inf  ;;  %v243_v51 = vpop.f32.mrf.mxu0  ;;  %v380_v52 = vpop.f32.mrf.mxu1 }
 0x100   :  { %v2058_v53 = vmax.f32 %v968_v32, %v991_v49  ;;  %v960_v54 = vsel %vm949_vm1, %v937_v38, %v938_v47  ;;  %v1090_v56 = vsel %vm949_vm1, %v1060_v50, %v1061_v48 }
 0x101   :  { %v970_v55 = vadd.f32 %v960_v54, %v231_v26  ;;  %v245_v59 = vpop.f32.mrf.mxu0  ;;  %v382_v60 = vpop.f32.mrf.mxu1  ;;  %v2066_v61 = vadd.f32 %v1090_v56, %v368_v27 }
 0x102   :  { %v939_v62 = vrot.slane %v245_v59, 1  ;;  %v1062_v63 = vrot.slane %v382_v60, 1 }
 0x103   :  { %v249_v1 = vpop.f32.mrf.mxu0  ;;  %v386_v2 = vpop.f32.mrf.mxu1 }
 0x104   :  { %v959_v3 = vsel %vm949_vm1, %v938_v47, %v939_v62  ;;  %v1089_v4 = vsel %vm949_vm1, %v1061_v48, %v1062_v63 }
 0x105   :  { %v251_v5 = vpop.f32.mrf.mxu0  ;;  %v388_v6 = vpop.f32.mrf.mxu1  ;;  %v971_v8 = vadd.f32 %v959_v3, %v237_v39  ;;  %v2072_v9 = vadd.f32 %v1089_v4, %v374_v40 }
 0x106   :  { %v940_v10 = vrot.slane %v251_v5, 1  ;;  %v1063_v11 = vrot.slane %v388_v6, 1 }
 0x107   :  { %v255_v12 = vpop.f32.mrf.mxu0  ;;  %v392_v13 = vpop.f32.mrf.mxu1  ;;  %v993_v14 = vsel %vm983_vm2, %v971_v8, -inf }
 0x108   :  { %v958_v15 = vsel %vm949_vm1, %v939_v62, %v940_v10  ;;  %v2078_v16 = vmax.f32 %v970_v55, %v993_v14  ;;  %v1088_v18 = vsel %vm949_vm1, %v1062_v63, %v1063_v11 }
 0x109   :  { %v972_v17 = vadd.f32 %v958_v15, %v243_v51  ;;  %v257_v19 = vpop.f32.mrf.mxu0  ;;  %v394_v20 = vpop.f32.mrf.mxu1  ;;  %v2082_v21 = vadd.f32 %v1088_v18, %v380_v52 }
 0x10a   :  { %v941_v22 = vrot.slane %v257_v19, 1  ;;  %v1064_v23 = vrot.slane %v394_v20, 1 }
 0x10b   :  { %v261_v24 = vpop.f32.mrf.mxu0  ;;  %v398_v25 = vpop.f32.mrf.mxu1 }
 0x10c   :  { %v957_v26 = vsel %vm949_vm1, %v940_v10, %v941_v22  ;;  %v1087_v27 = vsel %vm949_vm1, %v1063_v11, %v1064_v23 }
 0x10d   :  { %v973_v30 = vadd.f32 %v957_v26, %v249_v1  ;;  %v2088_v31 = vadd.f32 %v1087_v27, %v386_v2  ;;  %v263_v32 = vpop.f32.mrf.mxu0  ;;  %v400_v33 = vpop.f32.mrf.mxu1 }
 0x10e   :  { %v942_v34 = vrot.slane %v263_v32, 1  ;;  %v1065_v35 = vrot.slane %v400_v33, 1 }
 0x10f   :  { %v995_v37 = vsel %vm983_vm2, %v973_v30, -inf  ;;  %v267_v38 = vpop.f32.mrf.mxu0  ;;  %v404_v39 = vpop.f32.mrf.mxu1 }
 0x110   :  { %v2092_v40 = vmax.f32 %v972_v17, %v995_v37  ;;  %v956_v41 = vsel %vm949_vm1, %v941_v22, %v942_v34  ;;  %v1086_v42 = vsel %vm949_vm1, %v1064_v23, %v1065_v35  ;;  %v1005_v22 = vrot.slane %v2037_v28, 4 }
 0x111   :  { %v974_v44 = vadd.f32 %v956_v41, %v255_v12  ;;  %v2098_v45 = vadd.f32 %v1086_v42, %v392_v13  ;;  %v269_v46 = vpop.f32.mrf.mxu0  ;;  %v406_v47 = vpop.f32.mrf.mxu1 }
 0x112   :  { %v943_v48 = vrot.slane %v269_v46, 1  ;;  %v1066_v49 = vrot.slane %v406_v47, 1  ;;  %v1012_v47 = vrot.slane %v2058_v53, 4 }
 0x113   :  { %v273_v51 = vpop.f32.mrf.mxu0  ;;  %v410_v52 = vpop.f32.mrf.mxu1 }
 0x114   :  { %v955_v54 = vsel %vm949_vm1, %v942_v34, %v943_v48  ;;  %v1085_v55 = vsel %vm949_vm1, %v1065_v35, %v1066_v49  ;;  %v1047_v35 = vrot.slane %v2039_v29, 4 }
 0x115   :  { %v975_v56 = vadd.f32 %v955_v54, %v261_v24  ;;  %v2104_v59 = vadd.f32 %v1085_v55, %v398_v25  ;;  %v275_v60 = vpop.f32.mrf.mxu0  ;;  %v412_v62 = vpop.f32.mrf.mxu1 }
 0x116   :  { %v944_v63 = vrot.slane %v275_v60, 1  ;;  %v1067_v1 = vrot.slane %v412_v62, 1 }
 0x117   :  { %v997_v2 = vsel %vm983_vm2, %v975_v56, -inf  ;;  %v416_v3 = vpop.f32.mrf.mxu1  ;;  %v2108_v4 = vpop.f32.mrf.mxu0 }
 0x118   :  { %v2110_v5 = vmax.f32 %v974_v44, %v997_v2  ;;  %v953_v6 = vsel %vm949_vm1, %v944_v63, %v945_v0  ;;  %v954_v8 = vsel %vm949_vm1, %v943_v48, %v944_v63  ;;  %v1084_v12 = vsel %vm949_vm1, %v1066_v49, %v1067_v1 }
 0x119   :  { %v976_v10 = vadd.f32 %v954_v8, %v267_v38  ;;  %v977_v11 = vadd.f32 %v953_v6, %v273_v51  ;;  %v418_v13 = vpop.f32.mrf.mxu1  ;;  %v2120_v14 = vpop.f32.mrf.mxu0  ;;  %v2122_v15 = vadd.f32 %v1084_v12, %v404_v39  ;;  %v1108_v23 = vrot.slane %v2108_v4, 2 }
 0x11a   :  { %v1068_v17 = vrot.slane %v418_v13, 1  ;;  %v1006_v39 = vmax.f32 %v2037_v28, %v1005_v22 }
 0x11b   :  { %v999_v57 = vsel %vm983_vm2, %v977_v11, -inf  ;;  %v422_v18 = vpop.f32.mrf.mxu1  ;;  %v535_v19 = vpop.f32.mrf.mxu0 }
 0x11c   :  { %v2127_v0 = vmax.f32 %v976_v10, %v999_v57  ;;  %v1083_v20 = vsel %vm949_vm1, %v1067_v1, %v1068_v17  ;;  %v1109_v25 = vrot.slane %v535_v19, 2  ;;  %v1007_v55 = vrot.slane %v1006_v39, 2 }
 0x11d   :  { %v2133_v24 = vadd.f32 %v1083_v20, %v410_v52  ;;  %v424_v26 = vpop.f32.mrf.mxu1  ;;  %v2135_v27 = vpop.f32.mrf.mxu0  ;;  %v1048_v52 = vmax.f32 %v2039_v29, %v1047_v35  ;;  %v1013_v1 = vmax.f32 %v2058_v53, %v1012_v47 }
 0x11e   :  { %v1069_v30 = vrot.slane %v424_v26, 1  ;;  %v1139_v32 = vsel %vm1124_vm3, %v1108_v23, %v1109_v25  ;;  %v1054_v26 = vrot.slane %v2053_v43, 4 }
 0x11f   :  { %v428_v33 = vpop.f32.mrf.mxu1  ;;  %v541_v34 = vpop.f32.mrf.mxu0  ;;  %v1141_v37 = vadd.f32 %v1139_v32, %v2066_v61  ;;  %v1049_v10 = vrot.slane %v1048_v52, 2  ;;  %v1014_v20 = vrot.slane %v1013_v1, 2 }
 0x120   :  { %v1082_v38 = vsel %vm949_vm1, %v1068_v17, %v1069_v30  ;;  %v1110_v42 = vrot.slane %v541_v34, 2  ;;  %v1008_v17 = vmax.f32 %v1006_v39, %v1007_v55 }
 0x121   :  { %v2146_v41 = vadd.f32 %v1082_v38, %v416_v3  ;;  %v430_v44 = vpop.f32.mrf.mxu1  ;;  %v2148_v46 = vpop.f32.mrf.mxu0 }
 0x122   :  { %v1070_v48 = vrot.slane %v430_v44, 1  ;;  %v1138_v49 = vsel %vm1124_vm3, %v1109_v25, %v1110_v42  ;;  %v1009_v39 = vrot.slane %v1008_v17, 1 }
 0x123   :  { %v434_v61 = vpop.f32.mrf.mxu1  ;;  %v547_v51 = vpop.f32.mrf.mxu0  ;;  %v1142_v28 = vadd.f32 %v1138_v49, %v2072_v9 }
 0x124   :  { %v1081_v54 = vsel %vm949_vm1, %v1069_v30, %v1070_v48  ;;  %v1111_v60 = vrot.slane %v547_v51, 2  ;;  %v1015_v51 = vmax.f32 %v1013_v1, %v1014_v20 }
 0x125   :  { %v2158_v56 = vadd.f32 %v1081_v54, %v422_v18  ;;  %v436_v62 = vpop.f32.mrf.mxu1  ;;  %v2160_v63 = vpop.f32.mrf.mxu0  ;;  %v1164_v2 = vsel %vm1158_vm4, %v1142_v28, -inf  ;;  %v1055_v54 = vmax.f32 %v2053_v43, %v1054_v26 }
 0x126   :  { %v1071_v3 = vrot.slane %v436_v62, 1  ;;  %v1179_v6 = vmax.f32 %v1141_v37, %v1164_v2  ;;  %v1137_v29 = vsel %vm1124_vm3, %v1110_v42, %v1111_v60  ;;  %v2179_v37 = vmax.f32 %v1048_v52, %v1049_v10 }
 0x127   :  { %v440_v9 = vpop.f32.mrf.mxu1  ;;  %v553_v8 = vpop.f32.mrf.mxu0  ;;  %v1143_v11 = vadd.f32 %v1137_v29, %v2082_v21  ;;  %v1019_v21 = vrot.slane %v2078_v16, 4  ;;  %v1033_v10 = vrot.slane %v2110_v5, 4 }
 0x128   :  { %v1080_v12 = vsel %vm949_vm1, %v1070_v48, %v1071_v3  ;;  %v1112_v13 = vrot.slane %v553_v8, 2  ;;  %v1180_v57 = vrot.slane %v1179_v6, 4  ;;  %v2197_v8 = vmax.f32 %v1008_v17, %v1009_v39 }
 0x129   :  { %v2170_v53 = vadd.f32 %v1080_v12, %v428_v33  ;;  %v442_v18 = vpop.f32.mrf.mxu1  ;;  %v2172_v19 = vpop.f32.mrf.mxu0  ;;  %v1020_v55 = vmax.f32 %v2078_v16, %v1019_v21  ;;  %v1051_v36 = vrot.slane %v2179_v37, 1 }
 0x12a   :  { %v1136_v22 = vsel %vm1124_vm3, %v1111_v60, %v1112_v13  ;;  %v1072_v25 = vrot.slane %v442_v18, 1  ;;  %v1181_v30 = vmax.f32 %v1179_v6, %v1180_v57 }
 0x12b   :  { %v1144_v32 = vadd.f32 %v1136_v22, %v2088_v31  ;;  %v446_v34 = vpop.f32.mrf.mxu1  ;;  %v559_v35 = vpop.f32.mrf.mxu0  ;;  %v1021_v20 = vrot.slane %v1020_v55, 2  ;;  %v1040_v22 = vrot.slane %v2127_v0, 4 }
 0x12c   :  { %v1079_v33 = vsel %vm949_vm1, %v1071_v3, %v1072_v25  ;;  %v1113_v38 = vrot.slane %v559_v35, 2  ;;  %v1182_v42 = vrot.slane %v1181_v30, 2 }
 0x12d   :  { %v1166_v44 = vsel %vm1158_vm4, %v1144_v32, -inf  ;;  %v2185_v47 = vadd.f32 %v1079_v33, %v434_v61  ;;  %v448_v48 = vpop.f32.mrf.mxu1  ;;  %v2187_v49 = vpop.f32.mrf.mxu0  ;;  %v1026_v61 = vrot.slane %v2092_v40, 4  ;;  %v1034_v33 = vmax.f32 %v2110_v5, %v1033_v10 }
 0x12e   :  { %v1186_v31 = vmax.f32 %v1143_v11, %v1166_v44  ;;  %v1135_v52 = vsel %vm1124_vm3, %v1112_v13, %v1113_v38  ;;  %v1073_v28 = vrot.slane %v448_v48, 1  ;;  %v1183_v60 = vmax.f32 %v1181_v30, %v1182_v42 }
 0x12f   :  { %v1145_v62 = vadd.f32 %v1135_v52, %v2098_v45  ;;  %v452_v2 = vpop.f32.mrf.mxu1  ;;  %v565_v3 = vpop.f32.mrf.mxu0  ;;  %v1016_v45 = vrot.slane %v1015_v51, 1  ;;  %v1041_v5 = vmax.f32 %v2127_v0, %v1040_v22 }
 0x130   :  { %v1187_v6 = vrot.slane %v1186_v31, 4  ;;  %v1078_v1 = vsel %vm949_vm1, %v1072_v25, %v1073_v28  ;;  %v1114_v29 = vrot.slane %v565_v3, 2  ;;  %v1184_v11 = vrot.slane %v1183_v60, 1 }
 0x131   :  { %v2200_v43 = vadd.f32 %v1078_v1, %v440_v9  ;;  %v454_v16 = vpop.f32.mrf.mxu1  ;;  %v2202_v12 = vpop.f32.mrf.mxu0  ;;  %v1027_v9 = vmax.f32 %v2092_v40, %v1026_v61 }
 0x132   :  { %v1188_v13 = vmax.f32 %v1186_v31, %v1187_v6  ;;  %v1134_v57 = vsel %vm1124_vm3, %v1113_v38, %v1114_v29  ;;  %v1074_v18 = vrot.slane %v454_v16, 1  ;;  %v2207_v25 = vmax.f32 %v1183_v60, %v1184_v11 }
 0x133   :  { %v1146_v17 = vadd.f32 %v1134_v57, %v2104_v59  ;;  %v458_v26 = vpop.f32.mrf.mxu1  ;;  %v571_v21 = vpop.f32.mrf.mxu0  ;;  %v2224_v60 = vmax.f32 %v1015_v51, %v1016_v45  ;;  %v1028_v45 = vrot.slane %v1027_v9, 2 }
 0x134   :  { %v1189_v30 = vrot.slane %v1188_v13, 2  ;;  %v1077_v32 = vsel %vm949_vm1, %v1073_v28, %v1074_v18  ;;  %v1115_v35 = vrot.slane %v571_v21, 2  ;;  %v1056_v28 = vrot.slane %v1055_v54, 2 }
 0x135   :  { %v1168_v39 = vsel %vm1158_vm4, %v1146_v17, -inf  ;;  %v2218_v42 = vadd.f32 %v1077_v32, %v446_v34  ;;  %v460_v59 = vpop.f32.mrf.mxu1  ;;  %v2220_v44 = vpop.f32.mrf.mxu0 }
 0x136   :  { %v1190_v48 = vmax.f32 %v1188_v13, %v1189_v30  ;;  %v1193_v40 = vmax.f32 %v1145_v62, %v1168_v39  ;;  %v1133_v31 = vsel %vm1124_vm3, %v1114_v29, %v1115_v35  ;;  %v1075_v52 = vrot.slane %v460_v59, 1 }
 0x137   :  { %v1147_v3 = vadd.f32 %v1133_v31, %v2122_v15  ;;  %v577_v61 = vpop.f32.mrf.mxu0  ;;  %v2228_v6 = vpop.f32.mrf.mxu1  ;;  %v1022_v29 = vmax.f32 %v1020_v55, %v1021_v20  ;;  %v1035_v13 = vrot.slane %v1034_v33, 2  ;;  %v1057_v22 = vmax.f32 %v1055_v54, %v1056_v28 }
 0x138   :  { %v1191_v34 = vrot.slane %v1190_v48, 1  ;;  %v1194_v1 = vrot.slane %v1193_v40, 4  ;;  %v1076_v10 = vsel %vm949_vm1, %v1074_v18, %v1075_v52  ;;  %v1091_v62 = vsel %vm949_vm1, %v1075_v52, %v1060_v50 }
 0x139   :  { %v2236_v51 = vadd.f32 %v1076_v10, %v452_v2  ;;  %v2238_v11 = vadd.f32 %v1091_v62, %v458_v26  ;;  %v1116_v0 = vrot.slane %v577_v61, 2  ;;  %v2240_v15 = vpop.f32.mrf.mxu0  ;;  %v2242_v16 = vpop.f32.mrf.mxu1  ;;  %v1042_v20 = vrot.slane %v1041_v5, 2 }
 0x13a   :  { %v2244_v57 = vmax.f32 %v1190_v48, %v1191_v34  ;;  %v1195_v18 = vmax.f32 %v1193_v40, %v1194_v1  ;;  %v1023_v30 = vrot.slane %v1022_v29, 1  ;;  %v1029_v48 = vmax.f32 %v1027_v9, %v1028_v45 }
 0x13b   :  { %v1132_v50 = vsel %vm1124_vm3, %v1115_v35, %v1116_v0  ;;  %v583_v55 = vpop.f32.mrf.mxu0  ;;  %v696_v2 = vpop.f32.mrf.mxu1  ;;  %v1036_v54 = vmax.f32 %v1034_v33, %v1035_v13  ;;  %v2259_v61 = vmax.f32 %v2179_v37, %v1051_v36  ;;  %v1043_v34 = vmax.f32 %v1041_v5, %v1042_v20 }
 0x13c   :  { %v1196_v26 = vrot.slane %v1195_v18, 2  ;;  %v1148_v21 = vadd.f32 %v1132_v50, %v2133_v24  ;;  %v1117_v32 = vrot.slane %v583_v55, 2  ;;  %v1058_v10 = vrot.slane %v1057_v22, 1 }
 0x13d   :  { %v2252_v39 = vpop.f32.mrf.mxu0  ;;  %v2254_v59 = vpop.f32.mrf.mxu1  ;;  %v2261_v62 = vmax.f32 %v1022_v29, %v1023_v30  ;;  %v1244_v33 = vrot.slane %v696_v2, 1  ;;  %v2570_v29 = vrot.slane %v2228_v6, 1  ;;  %v1044_v2 = vrot.slane %v1043_v34, 1 }
 0x13e   :  { %v1197_v40 = vmax.f32 %v1195_v18, %v1196_v26  ;;  %v1170_v35 = vsel %vm1158_vm4, %v1148_v21, -inf  ;;  %v1131_v9 = vsel %vm1124_vm3, %v1116_v0, %v1117_v32  ;;  %v1037_v18 = vrot.slane %v1036_v54, 1 }
 0x13f   :  { %v1200_v31 = vmax.f32 %v1147_v3, %v1170_v35  ;;  %v589_v52 = vpop.f32.mrf.mxu0  ;;  %v702_v28 = vpop.f32.mrf.mxu1  ;;  %v1030_v3 = vrot.slane %v1029_v48, 1  ;;  %v1149_v30 = vadd.f32 %v1131_v9, %v2146_v41  ;;  %v2291_v9 = vmax.f32 %v1057_v22, %v1058_v10 }
 0x140   :  { %v1198_v24 = vrot.slane %v1197_v40, 1  ;;  %v1118_v1 = vrot.slane %v589_v52, 2  ;;  %v1245_v20 = vrot.slane %v702_v28, 1 }
 0x141   :  { %v1201_v50 = vrot.slane %v1200_v31, 4  ;;  %v2265_v45 = vpop.f32.mrf.mxu0  ;;  %v2267_v13 = vpop.f32.mrf.mxu1 }
 0x142   :  { %v2269_v55 = vmax.f32 %v1197_v40, %v1198_v24  ;;  %v1130_v37 = vsel %vm1124_vm3, %v1117_v32, %v1118_v1  ;;  %v1292_v40 = vrot.slane %v2254_v59, 2  ;;  %v1273_v32 = vsel %vm949_vm1, %v2570_v29, %v1244_v33 }
 0x143   :  { %v1202_v5 = vmax.f32 %v1200_v31, %v1201_v50  ;;  %v1150_v36 = vadd.f32 %v1130_v37, %v2158_v56  ;;  %v595_v26 = vpop.f32.mrf.mxu0  ;;  %v708_v0 = vpop.f32.mrf.mxu1  ;;  %v2287_v24 = vmax.f32 %v1029_v48, %v1030_v3  ;;  %v2289_v50 = vmax.f32 %v1036_v54, %v1037_v18 }
 0x144   :  { %v1119_v31 = vrot.slane %v595_v26, 2  ;;  %v2571_v37 = vrot.slane %v2242_v16, 2  ;;  %v1272_v21 = vsel %vm949_vm1, %v1244_v33, %v1245_v20  ;;  %v1246_v29 = vrot.slane %v708_v0, 1 }
 0x145   :  { %v1203_v35 = vrot.slane %v1202_v5, 2  ;;  %v1172_v56 = vsel %vm1158_vm4, %v1150_v36, -inf  ;;  %v2285_v52 = vpop.f32.mrf.mxu0  ;;  %v710_v28 = vpop.f32.mrf.mxu1  ;;  %v2296_v26 = vmax.f32 %v1043_v34, %v1044_v2  ;;  %v1275_v38 = vadd.f32 %v1273_v32, %v2120_v14 }
 0x146   :  { %v1207_v41 = vmax.f32 %v1149_v30, %v1172_v56  ;;  %v1321_v22 = vsel %vm1124_vm3, %v2571_v37, %v1292_v40  ;;  %v1129_v10 = vsel %vm1124_vm3, %v1118_v1, %v1119_v31  ;;  %v1276_v34 = vadd.f32 %v1272_v21, %v2135_v27 }
 0x147   :  { %v1204_v59 = vmax.f32 %v1202_v5, %v1203_v35  ;;  %v601_v17 = vpop.f32.mrf.mxu0  ;;  %v714_v36 = vpop.f32.mrf.mxu1  ;;  %v1293_v14 = vrot.slane %v2267_v13, 2  ;;  %v1271_v30 = vsel %vm949_vm1, %v1245_v20, %v1246_v29  ;;  %v1294_v35 = vrot.slane %v710_v28, 2 }
 0x148   :  { %v1208_v48 = vrot.slane %v1207_v41, 4  ;;  %v1120_v3 = vrot.slane %v601_v17, 2  ;;  %v1247_v18 = vrot.slane %v714_v36, 1 }
 0x149   :  { %v1205_v54 = vrot.slane %v1204_v59, 1  ;;  %v2305_v33 = vpop.f32.mrf.mxu0  ;;  %v716_v5 = vpop.f32.mrf.mxu1 }
 0x14a   :  { %v1209_v0 = vmax.f32 %v1207_v41, %v1208_v48  ;;  %v1128_v17 = vsel %vm1124_vm3, %v1119_v31, %v1120_v3  ;;  %v1151_v41 = vadd.f32 %v1129_v10, %v2170_v53  ;;  %v1270_v27 = vsel %vm949_vm1, %v1246_v29, %v1247_v18 }
 0x14b   :  { %v2311_v2 = vmax.f32 %v1204_v59, %v1205_v54  ;;  %v1152_v1 = vadd.f32 %v1128_v17, %v2185_v47  ;;  %v607_v32 = vpop.f32.mrf.mxu0  ;;  %v720_v56 = vpop.f32.mrf.mxu1  ;;  %v1295_v13 = vrot.slane %v716_v5, 2  ;;  %v1320_v54 = vsel %vm1124_vm3, %v1292_v40, %v1293_v14 }
 0x14c   :  { %v1210_v36 = vrot.slane %v1209_v0, 2  ;;  %v1121_v59 = vrot.slane %v607_v32, 2  ;;  %v1248_v20 = vrot.slane %v720_v56, 1  ;;  %v1277_v53 = vadd.f32 %v1271_v30, %v2148_v46 }
 0x14d   :  { %v1174_v31 = vsel %vm1158_vm4, %v1152_v1, -inf  ;;  %v2323_v28 = vpop.f32.mrf.mxu0  ;;  %v722_v47 = vpop.f32.mrf.mxu1  ;;  %v1319_v29 = vsel %vm1124_vm3, %v1293_v14, %v1294_v35  ;;  %v1278_v5 = vadd.f32 %v1270_v27, %v2160_v63  ;;  %v2337_v46 = vadd.f32 %v1320_v54, %v1276_v34 }
 0x14e   :  { %v1211_v48 = vmax.f32 %v1209_v0, %v1210_v36  ;;  %v1214_v10 = vmax.f32 %v1151_v41, %v1174_v31  ;;  %v1269_v17 = vsel %vm949_vm1, %v1247_v18, %v1248_v20  ;;  %v1296_v1 = vrot.slane %v722_v47, 2 }
 0x14f   :  { %v613_v32 = vpop.f32.mrf.mxu0  ;;  %v726_v56 = vpop.f32.mrf.mxu1  ;;  %v1318_v0 = vsel %vm1124_vm3, %v1294_v35, %v1295_v13  ;;  %v2335_v36 = vadd.f32 %v1321_v22, %v1275_v38  ;;  %v1127_v14 = vsel %vm1124_vm3, %v1120_v3, %v1121_v59  ;;  %v1279_v31 = vadd.f32 %v1269_v17, %v2172_v19 }
 0x150   :  { %v1212_v21 = vrot.slane %v1211_v48, 1  ;;  %v1215_v37 = vrot.slane %v1214_v10, 4  ;;  %v1122_v40 = vrot.slane %v613_v32, 2  ;;  %v1249_v63 = vrot.slane %v726_v56, 1 }
 0x151   :  { %v2341_v30 = vpop.f32.mrf.mxu0  ;;  %v728_v18 = vpop.f32.mrf.mxu1  ;;  %v2349_v22 = vadd.f32 %v1319_v29, %v1277_v53  ;;  %v2351_v34 = vadd.f32 %v1318_v0, %v1278_v5  ;;  %v1317_v3 = vsel %vm1124_vm3, %v1295_v13, %v1296_v1 }
 0x152   :  { %v2344_v41 = vmax.f32 %v1211_v48, %v1212_v21  ;;  %v1216_v27 = vmax.f32 %v1214_v10, %v1215_v37  ;;  %v1126_v38 = vsel %vm1124_vm3, %v1121_v59, %v1122_v40  ;;  %v1153_v21 = vadd.f32 %v1127_v14, %v2200_v43 }
 0x153   :  { %v1154_v35 = vadd.f32 %v1126_v38, %v2218_v42  ;;  %v619_v47 = vpop.f32.mrf.mxu0  ;;  %v732_v54 = vpop.f32.mrf.mxu1  ;;  %v1268_v59 = vsel %vm949_vm1, %v1248_v20, %v1249_v63  ;;  %v1297_v53 = vrot.slane %v728_v18, 2  ;;  %v2365_v5 = vadd.f32 %v1317_v3, %v1279_v31 }
 0x154   :  { %v1217_v32 = vrot.slane %v1216_v27, 2  ;;  %v1123_v37 = vrot.slane %v619_v47, 2  ;;  %v1250_v48 = vrot.slane %v732_v54, 1  ;;  %v1280_v3 = vadd.f32 %v1268_v59, %v2187_v49 }
 0x155   :  { %v1176_v19 = vsel %vm1158_vm4, %v1154_v35, -inf  ;;  %v2361_v10 = vpop.f32.mrf.mxu0  ;;  %v734_v29 = vpop.f32.mrf.mxu1  ;;  %v1316_v4 = vsel %vm1124_vm3, %v1296_v1, %v1297_v53 }
 0x156   :  { %v1218_v13 = vmax.f32 %v1216_v27, %v1217_v32  ;;  %v1221_v17 = vmax.f32 %v1153_v21, %v1176_v19  ;;  %v1125_v43 = vsel %vm1124_vm3, %v1122_v40, %v1123_v37  ;;  %v1140_v56 = vsel %vm1124_vm3, %v1123_v37, %v1108_v23 }
 0x157   :  { %v1155_v20 = vadd.f32 %v1125_v43, %v2236_v51  ;;  %v1267_v0 = vsel %vm949_vm1, %v1249_v63, %v1250_v48  ;;  %v1298_v14 = vrot.slane %v734_v29, 2  ;;  %v738_v18 = vpop.f32.mrf.mxu1  ;;  %v1624_v38 = vpop.f32.mrf.mxu0  ;;  %v1156_v35 = vadd.f32 %v1140_v56, %v2238_v11 }
 0x158   :  { %v1219_v27 = vrot.slane %v1218_v13, 1  ;;  %v1222_v31 = vrot.slane %v1221_v17, 4  ;;  %v1281_v40 = vadd.f32 %v1267_v0, %v2202_v12  ;;  %v1251_v23 = vrot.slane %v738_v18, 1 }
 0x159   :  { %v1340_v47 = vrot.slane %v1624_v38, 3  ;;  %v740_v51 = vpop.f32.mrf.mxu1  ;;  %v2381_v54 = vpop.f32.mrf.mxu0  ;;  %v1178_v49 = vsel %vm1158_vm4, %v1156_v35, -inf  ;;  %v1315_v11 = vsel %vm1124_vm3, %v1297_v53, %v1298_v14 }
 0x15a   :  { %v2384_v63 = vmax.f32 %v1218_v13, %v1219_v27  ;;  %v1223_v32 = vmax.f32 %v1221_v17, %v1222_v31  ;;  %v1228_v21 = vmax.f32 %v1155_v20, %v1178_v49  ;;  %v1266_v12 = vsel %vm949_vm1, %v1250_v48, %v1251_v23 }
 0x15b   :  { %v1299_v1 = vrot.slane %v740_v51, 2  ;;  %v1339_v37 = vrot.slane %v2381_v54, 3  ;;  %v744_v19 = vpop.f32.mrf.mxu1  ;;  %v1627_v59 = vpop.f32.mrf.mxu0  ;;  %v1282_v13 = vadd.f32 %v1266_v12, %v2220_v44  ;;  %v2402_v27 = vadd.f32 %v1316_v4, %v1280_v3 }
 0x15c   :  { %v1224_v29 = vrot.slane %v1223_v32, 2  ;;  %v1252_v43 = vrot.slane %v744_v19, 1  ;;  %v1342_v17 = vrot.slane %v1627_v59, 3  ;;  %v1229_v56 = vrot.slane %v1228_v21, 4 }
 0x15d   :  { %v1314_v0 = vsel %vm1124_vm3, %v1298_v14, %v1299_v1  ;;  %v1370_v53 = vsel %vm1355_vm5, %v1339_v37, %v1340_v47  ;;  %v746_v48 = vpop.f32.mrf.mxu1  ;;  %v861_v20 = vpop.f32.mrf.mxu0  ;;  %v2404_v44 = vadd.f32 %v1315_v11, %v1281_v40 }
 0x15e   :  { %v1225_v38 = vmax.f32 %v1223_v32, %v1224_v29  ;;  %v1265_v31 = vsel %vm949_vm1, %v1251_v23, %v1252_v43  ;;  %v1230_v35 = vmax.f32 %v1228_v21, %v1229_v56  ;;  %v1300_v51 = vrot.slane %v746_v48, 2 }
 0x15f   :  { %v1283_v14 = vadd.f32 %v1265_v31, %v2240_v15  ;;  %v1341_v49 = vrot.slane %v861_v20, 3  ;;  %v750_v12 = vpop.f32.mrf.mxu1  ;;  %v1630_v19 = vpop.f32.mrf.mxu0  ;;  %v2409_v59 = vadd.f32 %v1314_v0, %v1282_v13  ;;  %v1372_v42 = vadd.f32 %v1370_v53, %v2335_v36 }
 0x160   :  { %v1253_v18 = vrot.slane %v750_v12, 1  ;;  %v1344_v32 = vrot.slane %v1630_v19, 3  ;;  %v1231_v3 = vrot.slane %v1230_v35, 2  ;;  %v1313_v4 = vsel %vm1124_vm3, %v1299_v1, %v1300_v51 }
 0x161   :  { %v1368_v40 = vsel %vm1355_vm5, %v1341_v49, %v1342_v17  ;;  %v1369_v15 = vsel %vm1355_vm5, %v1340_v47, %v1341_v49  ;;  %v752_v23 = vpop.f32.mrf.mxu1  ;;  %v871_v11 = vpop.f32.mrf.mxu0  ;;  %v1226_v21 = vrot.slane %v1225_v38, 1  ;;  %v2418_v29 = vadd.f32 %v1313_v4, %v1283_v14 }
 0x162   :  { %v1373_v13 = vadd.f32 %v1369_v15, %v2337_v46  ;;  %v1264_v36 = vsel %vm949_vm1, %v1252_v43, %v1253_v18  ;;  %v1374_v56 = vadd.f32 %v1368_v40, %v2349_v22  ;;  %v1301_v0 = vrot.slane %v752_v23, 2 }
 0x163   :  { %v1284_v1 = vadd.f32 %v1264_v36, %v2252_v39  ;;  %v1343_v53 = vrot.slane %v871_v11, 3  ;;  %v756_v48 = vpop.f32.mrf.mxu1  ;;  %v1633_v20 = vpop.f32.mrf.mxu0  ;;  %v1232_v31 = vmax.f32 %v1230_v35, %v1231_v3  ;;  %v2438_v40 = vmax.f32 %v1225_v38, %v1226_v21 }
 0x164   :  { %v1395_v47 = vsel %vm1389_vm6, %v1373_v13, -inf  ;;  %v1254_v49 = vrot.slane %v756_v48, 1  ;;  %v1346_v14 = vrot.slane %v1633_v20, 3  ;;  %v1312_v46 = vsel %vm1124_vm3, %v1300_v51, %v1301_v0 }
 0x165   :  { %v1410_v12 = vmax.f32 %v1372_v42, %v1395_v47  ;;  %v1366_v43 = vsel %vm1355_vm5, %v1343_v53, %v1344_v32  ;;  %v1367_v39 = vsel %vm1355_vm5, %v1342_v17, %v1343_v53  ;;  %v758_v22 = vpop.f32.mrf.mxu1  ;;  %v881_v19 = vpop.f32.mrf.mxu0  ;;  %v2433_v4 = vadd.f32 %v1312_v46, %v1284_v1 }
 0x166   :  { %v1375_v35 = vadd.f32 %v1367_v39, %v2351_v34  ;;  %v1263_v3 = vsel %vm949_vm1, %v1253_v18, %v1254_v49  ;;  %v1302_v15 = vrot.slane %v758_v22, 2  ;;  %v1345_v23 = vrot.slane %v881_v19, 3 }
 0x167   :  { %v1411_v42 = vrot.slane %v1410_v12, 4  ;;  %v1285_v51 = vadd.f32 %v1263_v3, %v2265_v45  ;;  %v762_v11 = vpop.f32.mrf.mxu1  ;;  %v2441_v13 = vpop.f32.mrf.mxu0  ;;  %v1376_v17 = vadd.f32 %v1366_v43, %v2365_v5  ;;  %v1233_v46 = vrot.slane %v1232_v31, 1 }
 0x168   :  { %v1397_v36 = vsel %vm1389_vm6, %v1375_v35, -inf  ;;  %v1255_v1 = vrot.slane %v762_v11, 1  ;;  %v1348_v34 = vrot.slane %v2441_v13, 3  ;;  %v1311_v38 = vsel %vm1124_vm3, %v1301_v0, %v1302_v15 }
 0x169   :  { %v1412_v53 = vmax.f32 %v1410_v12, %v1411_v42  ;;  %v1417_v18 = vmax.f32 %v1374_v56, %v1397_v36  ;;  %v1364_v45 = vsel %vm1355_vm5, %v1345_v23, %v1346_v14  ;;  %v764_v21 = vpop.f32.mrf.mxu1  ;;  %v891_v48 = vpop.f32.mrf.mxu0  ;;  %v2451_v20 = vadd.f32 %v1311_v38, %v1285_v51 }
 0x16a   :  { %v1365_v5 = vsel %vm1355_vm5, %v1344_v32, %v1345_v23  ;;  %v1262_v47 = vsel %vm949_vm1, %v1254_v49, %v1255_v1  ;;  %v1378_v0 = vadd.f32 %v1364_v45, %v2404_v44  ;;  %v1303_v35 = vrot.slane %v764_v21, 2 }
 0x16b   :  { %v1413_v43 = vrot.slane %v1412_v53, 2  ;;  %v1418_v12 = vrot.slane %v1417_v18, 4  ;;  %v1377_v56 = vadd.f32 %v1365_v5, %v2402_v27  ;;  %v768_v39 = vpop.f32.mrf.mxu1  ;;  %v2459_v22 = vpop.f32.mrf.mxu0  ;;  %v1286_v19 = vadd.f32 %v1262_v47, %v2285_v52 }
 0x16c   :  { %v1347_v3 = vrot.slane %v891_v48, 3  ;;  %v1256_v42 = vrot.slane %v768_v39, 1  ;;  %v1350_v23 = vrot.slane %v2459_v22, 3  ;;  %v1310_v44 = vsel %vm1124_vm3, %v1302_v15, %v1303_v35 }
 0x16d   :  { %v1414_v51 = vmax.f32 %v1412_v53, %v1413_v43  ;;  %v1419_v32 = vmax.f32 %v1417_v18, %v1418_v12  ;;  %v1399_v49 = vsel %vm1389_vm6, %v1377_v56, -inf  ;;  %v770_v11 = vpop.f32.mrf.mxu1  ;;  %v901_v13 = vpop.f32.mrf.mxu0  ;;  %v2469_v52 = vmax.f32 %v1232_v31, %v1233_v46 }
 0x16e   :  { %v1424_v27 = vmax.f32 %v1376_v17, %v1399_v49  ;;  %v1363_v36 = vsel %vm1355_vm5, %v1346_v14, %v1347_v3  ;;  %v1362_v53 = vsel %vm1355_vm5, %v1347_v3, %v1348_v34  ;;  %v1334_v17 = vadd.f32 %v1310_v44, %v1286_v19 }
 0x16f   :  { %v1415_v38 = vrot.slane %v1414_v51, 1  ;;  %v1420_v45 = vrot.slane %v1419_v32, 2  ;;  %v1379_v18 = vadd.f32 %v1363_v36, %v2409_v59  ;;  %v774_v21 = vpop.f32.mrf.mxu1  ;;  %v2474_v48 = vpop.f32.mrf.mxu0  ;;  %v1261_v15 = vsel %vm949_vm1, %v1255_v1, %v1256_v42 }
 0x170   :  { %v1425_v5 = vrot.slane %v1424_v27, 4  ;;  %v1304_v47 = vrot.slane %v770_v11, 2  ;;  %v1287_v46 = vadd.f32 %v1261_v15, %v2305_v33  ;;  %v1349_v22 = vrot.slane %v901_v13, 3 }
 0x171   :  { %v1416_v43 = vmax.f32 %v1414_v51, %v1415_v38  ;;  %v1421_v14 = vmax.f32 %v1419_v32, %v1420_v45  ;;  %v1401_v31 = vsel %vm1389_vm6, %v1379_v18, -inf  ;;  %v2481_v12 = vpop.f32.mrf.mxu1  ;;  %v911_v19 = vpop.f32.mrf.mxu0  ;;  %v2572_v1 = vmax.f32 %v2197_v8, %v2207_v25 }
 0x172   :  { %v1426_v56 = vmax.f32 %v1424_v27, %v1425_v5  ;;  %v1431_v59 = vmax.f32 %v1378_v0, %v1401_v31  ;;  %v1309_v39 = vsel %vm1124_vm3, %v1303_v35, %v1304_v47  ;;  %v1380_v32 = vadd.f32 %v1362_v53, %v2418_v29 }
 0x173   :  { %v2488_v3 = vmax.f32 %v2572_v1, %v1416_v43  ;;  %v1422_v51 = vrot.slane %v1421_v14, 1  ;;  %v1257_v49 = vrot.slane %v774_v21, 1  ;;  %v2491_v44 = vadd.f32 %v1309_v39, %v1287_v46  ;;  %v780_v25 = vpop.f32.mrf.mxu1  ;;  %v1645_v53 = vpop.f32.mrf.mxu0 }
 0x174   :  { %v1427_v11 = vrot.slane %v1426_v56, 2  ;;  %v1432_v33 = vrot.slane %v1431_v59, 4  ;;  %v1361_v0 = vsel %vm1355_vm5, %v1348_v34, %v1349_v22  ;;  %v1360_v35 = vsel %vm1355_vm5, %v1349_v22, %v1350_v23 }
 0x175   :  { %v1423_v27 = vmax.f32 %v1421_v14, %v1422_v51  ;;  %v1381_v13 = vadd.f32 %v1361_v0, %v2433_v4  ;;  %v1260_v8 = vsel %vm949_vm1, %v1256_v42, %v1257_v49  ;;  %v1352_v45 = vrot.slane %v2474_v48, 3 }
 0x176   :  { %v1428_v36 = vmax.f32 %v1426_v56, %v1427_v11  ;;  %v1433_v29 = vmax.f32 %v1431_v59, %v1432_v33  ;;  %v1288_v38 = vadd.f32 %v1260_v8, %v2323_v28  ;;  %v2573_v34 = vmax.f32 %v2224_v60, %v2244_v57  ;;  %v782_v59 = vpop.f32.mrf.mxu1 }
 0x177   :  { %v1403_v21 = vsel %vm1389_vm6, %v1381_v13, -inf  ;;  %v1305_v4 = vrot.slane %v2481_v12, 2  ;;  %v1351_v5 = vrot.slane %v911_v19, 3  ;;  %v1258_v14 = vrot.slane %v780_v25, 1 }
 0x178   :  { %v1467_v18 = vmax.f32 %v2573_v34, %v1423_v27  ;;  %v1429_v42 = vrot.slane %v1428_v36, 1  ;;  %v1434_v15 = vrot.slane %v1433_v29, 2  ;;  %v1438_v43 = vmax.f32 %v1380_v32, %v1403_v21 }
 0x179   :  { %v1382_v28 = vadd.f32 %v1360_v35, %v2451_v20  ;;  %v1308_v48 = vsel %vm1124_vm3, %v1304_v47, %v1305_v4  ;;  %v1359_v60 = vsel %vm1355_vm5, %v1350_v23, %v1351_v5  ;;  %v1354_v57 = vrot.slane %v1645_v53, 3  ;;  %v921_v23 = vpop.f32.mrf.mxu0 }
 0x17a   :  { %v1430_v31 = vmax.f32 %v1428_v36, %v1429_v42  ;;  %v1435_v46 = vmax.f32 %v1433_v29, %v1434_v15  ;;  %v1439_v56 = vrot.slane %v1438_v43, 4  ;;  %v1358_v12 = vsel %vm1355_vm5, %v1351_v5, %v1352_v45 }
 0x17b   :  { %v1336_v39 = vadd.f32 %v1308_v48, %v1288_v38  ;;  %v1383_v22 = vadd.f32 %v1359_v60, %v1334_v17  ;;  %v1259_v20 = vsel %vm949_vm1, %v1257_v49, %v1258_v14  ;;  %v2574_v19 = vrot.slane %v2228_v6, 1 }
 0x17c   :  { %v2575_v1 = vmax.f32 %v2261_v62, %v2269_v55  ;;  %v1436_v32 = vrot.slane %v1435_v46, 1  ;;  %v1440_v11 = vmax.f32 %v1438_v43, %v1439_v56  ;;  %v1289_v33 = vadd.f32 %v1259_v20, %v2341_v30 }
 0x17d   :  { %v1274_v47 = vsel %vm949_vm1, %v1258_v14, %v2574_v19  ;;  %v1405_v17 = vsel %vm1389_vm6, %v1383_v22, -inf  ;;  %v1371_v6 = vsel %vm1355_vm5, %v1354_v57, %v1339_v37  ;;  %v1306_v49 = vrot.slane %v782_v59, 2 }
 0x17e   :  { %v1468_v51 = vmax.f32 %v2575_v1, %v1430_v31  ;;  %v1290_v0 = vadd.f32 %v1274_v47, %v2361_v10  ;;  %v1437_v27 = vmax.f32 %v1435_v46, %v1436_v32  ;;  %v1441_v35 = vrot.slane %v1440_v11, 2 }
 0x17f   :  { %v1445_v13 = vmax.f32 %v1382_v28, %v1405_v17  ;;  %v1353_v62 = vrot.slane %v921_v23, 3  ;;  %v1307_v55 = vsel %vm1124_vm3, %v1305_v4, %v1306_v49  ;;  %v2576_v30 = vrot.slane %v2242_v16, 2 }
 0x180   :  { %v1241_v10 = vmax.f32 %v2259_v61, %v2438_v40  ;;  %v1242_v54 = vmax.f32 %v2291_v9, %v2469_v52  ;;  %v1442_v37 = vmax.f32 %v1440_v11, %v1441_v35  ;;  %v1337_v36 = vadd.f32 %v1307_v55, %v1289_v33 }
 0x181   :  { %v1322_v8 = vsel %vm1124_vm3, %v1306_v49, %v2576_v30  ;;  %v1446_v25 = vrot.slane %v1445_v13, 4  ;;  %v1356_v38 = vsel %vm1355_vm5, %v1353_v62, %v1354_v57  ;;  %v1357_v53 = vsel %vm1355_vm5, %v1352_v45, %v1353_v62 }
 0x182   :  { %v1338_v29 = vadd.f32 %v1322_v8, %v1290_v0  ;;  %v2577_v16 = vmax.f32 %v2287_v24, %v2311_v2  ;;  %v1483_v61 = vsel %vm1482_vm7, %v1467_v18, %v2488_v3  ;;  %v1443_v40 = vrot.slane %v1442_v37, 1 }
 0x183   :  { %v1447_v21 = vmax.f32 %v1445_v13, %v1446_v25  ;;  %v1385_v52 = vadd.f32 %v1357_v53, %v1336_v39  ;;  %v1384_v4 = vadd.f32 %v1358_v12, %v2491_v44  ;;  %v1386_v5 = vadd.f32 %v1356_v38, %v1337_v36 }
 0x184   :  { %v1469_v34 = vmax.f32 %v2577_v16, %v1437_v27  ;;  %v1387_v9 = vadd.f32 %v1371_v6, %v1338_v29  ;;  %v1485_v42 = vsel %vm1484_vm8, %v1468_v51, %v1483_v61  ;;  %v1444_v15 = vmax.f32 %v1442_v37, %v1443_v40 }
 0x185   :  { %v1448_v43 = vrot.slane %v1447_v21, 2  ;;  %v1407_v58 = vsel %vm1389_vm6, %v1385_v52, -inf  ;;  %v2578_v44 = vmax.f32 %v2289_v50, %v2344_v41  ;;  %v2579_v59 = vmax.f32 %v2296_v26, %v2384_v63 }
 0x186   :  { %v1409_v24 = vsel %vm1389_vm6, %v1387_v9, -inf  ;;  %v1452_v2 = vmax.f32 %v1384_v4, %v1407_v58  ;;  %v1487_v3 = vsel %vm1486_vm9, %v1469_v34, %v1485_v42 }
 0x187   :  { %v1459_v45 = vmax.f32 %v1386_v5, %v1409_v24  ;;  %v1449_v18 = vmax.f32 %v1447_v21, %v1448_v43  ;;  %v1470_v14 = vmax.f32 %v2578_v44, %v1444_v15 }
 0x188   :  { %v1453_v28 = vrot.slane %v1452_v2, 4 }
 0x189   :  { %v1460_v48 = vrot.slane %v1459_v45, 4  ;;  %v1450_v60 = vrot.slane %v1449_v18, 1  ;;  %v1489_v57 = vsel %vm1488_vm10, %v1470_v14, %v1487_v3 }
 0x18a   :  { %v1454_v31 = vmax.f32 %v1452_v2, %v1453_v28 }
 0x18b   :  { %v1461_v46 = vmax.f32 %v1459_v45, %v1460_v48  ;;  %v1451_v56 = vmax.f32 %v1449_v18, %v1450_v60 }
 0x18c   :  { %v1455_v12 = vrot.slane %v1454_v31, 2 }
 0x18d   :  { %v1462_v7 = vrot.slane %v1461_v46, 2  ;;  %v1471_v39 = vmax.f32 %v2579_v59, %v1451_v56 }
 0x18e   :  { %v1456_v22 = vmax.f32 %v1454_v31, %v1455_v12 }
 0x18f   :  { %v1463_v20 = vmax.f32 %v1461_v46, %v1462_v7  ;;  %v1491_v19 = vsel %vm1490_vm11, %v1471_v39, %v1489_v57 }
 0x190   :  { %v1457_v47 = vrot.slane %v1456_v22, 1 }
 0x191   :  { %v1464_v50 = vrot.slane %v1463_v20, 1 }
 0x192   :  { %v1458_v41 = vmax.f32 %v1456_v22, %v1457_v47 }
 0x193   :  { %v1465_v23 = vmax.f32 %v1463_v20, %v1464_v50 }
 0x194   :  { %v1472_v1 = vmax.f32 %v1241_v10, %v1458_v41 }
 0x195   :  { %v1473_v51 = vmax.f32 %v1242_v54, %v1465_v23 }
 0x196   :  { %v1493_v32 = vsel %vm1492_vm12, %v1472_v1, %v1491_v19 }
 0x197   :  { %v1495_v11 = vsel %vm1494_vm13, %v1473_v51, %v1493_v32 }
 0x198   :  { %1497 = vst [vmem:[#allocation7] sm:$0xff] %v1495_v11 }
 0x199   :  { %1713 = shalt.err (!%p1710_p0)
}
 0x19a   :  { %1507 = dma.vmem_to_hbm [thread:$0]  %s1505_s1, 128, %s2569_s2, [#allocation4]  }
 0x19b   :  { %1726 = dma.done.wait [#allocation4], 128  }
 0x19c   :  { %1727 = vsyncadd [#allocation4], 4294967168 }
 0x19d   :  { %1511 = vsyncpa [#allocation3], 1 }
 0x19e   :  { %1512 = vsyncpa [#allocation6], 1 }
 0x19f   :  { %1513 = vsyncpa [#allocation4], 1 }

</bundles_post_ra>
